<compile_context>
chip_gen: v7x
topology: tpu7x:2x2x1
jax: 0.10.0
libtpu: 0.0.40
codegen_flags: <defaults>
</compile_context>

<pallas_src>
import functools
import math

import jax
import jax.numpy as jnp
from jax.experimental import pallas as pl
from jax.experimental.pallas import tpu as pltpu


CFG = dict(
    vocab=100,
    max_pos=16,
    type_vocab=2,
    hidden=128,        # lane-dense small config (multiple of 128)
    heads=2,           # head_dim = 64
    intermediate=256,  # multiple of 128
    layers=2,
    num_labels=4,
    probe_pad=128,     # probe matmul padded to a lane-dense width
)


# --------------------------- fused encoder kernel ---------------------------

def _ln(x, g, b):
    """LayerNorm in f32 (BERT eps)."""
    mu = jnp.mean(x, axis=-1, keepdims=True)
    xc = x - mu
    var = jnp.mean(xc * xc, axis=-1, keepdims=True)
    inv = jax.lax.rsqrt(var + 1e-12)
    return xc * inv * g + b


def _attention(qkv, *, num_heads, head_dim, hidden):
    """qkv: (S, 3H) f32 (1/sqrt(dh) folded into Q) -> context (S, H) f32.

    Heads are stacked once into (nh, S, dh) and both matmul phases are issued
    as single head-batched einsums (one MXU push per phase).
    # TODO(synk): for long sequences convert to a tiled online-softmax
    # (flash-style) loop; full (nh, S, S) scores are fine at S=8.
    """
    qkv16 = qkv.astype(jnp.bfloat16)
    qs, ks, vs = [], [], []
    for h in range(num_heads):
        lo = h * head_dim
        qs.append(qkv16[:, lo:lo + head_dim])
        ks.append(qkv16[:, hidden + lo:hidden + lo + head_dim])
        vs.append(qkv16[:, 2 * hidden + lo:2 * hidden + lo + head_dim])
    q = jnp.stack(qs, axis=0)   # (nh, S, dh) bf16
    k = jnp.stack(ks, axis=0)
    v = jnp.stack(vs, axis=0)

    s = jnp.einsum("hqd,hkd->hqk", q, k, preferred_element_type=jnp.float32)
    s = s - jnp.max(s, axis=-1, keepdims=True)
    p = jnp.exp(s)
    p = p * pl.reciprocal(jnp.sum(p, axis=-1, keepdims=True), approx=True)
    ctx = jnp.einsum("hqk,hkd->hqd", p.astype(jnp.bfloat16), v,
                     preferred_element_type=jnp.float32)   # (nh, S, dh) f32
    # Merge heads back to one lane-dense (S, H) slab.
    return jnp.concatenate([ctx[h] for h in range(num_heads)], axis=-1)


def _fused_bert_kernel(emb_ref, emb_g_ref, emb_b_ref,
                       qkv_w_ref, qkv_b_ref, o_w_ref, o_b_ref,
                       ln1_g_ref, ln1_b_ref,
                       ff1_w_ref, ff1_b_ref, ff2_w_ref, ff2_b_ref,
                       ln2_g_ref, ln2_b_ref,
                       probe_w_ref, probe_b_ref,
                       out_ref, *, num_layers, num_heads, head_dim, hidden):
    # One sequence per grid step.  All weights (stacked on a leading layer
    # axis) are VMEM-resident for the whole kernel.
    x = _ln(emb_ref[0], emb_g_ref[...], emb_b_ref[...])        # (S, H) f32

    for l in range(num_layers):                                # static unroll
        # Fused QKV projection (scale folded into Q weights/bias).
        qkv = jnp.dot(x.astype(jnp.bfloat16), qkv_w_ref[l],
                      preferred_element_type=jnp.float32) + qkv_b_ref[l]
        ctx = _attention(qkv, num_heads=num_heads,
                         head_dim=head_dim, hidden=hidden)     # (S, H)
        attn = jnp.dot(ctx.astype(jnp.bfloat16), o_w_ref[l],
                       preferred_element_type=jnp.float32) + o_b_ref[l]
        x = _ln(x + attn, ln1_g_ref[l], ln1_b_ref[l])          # add + LN fused

        ff = jnp.dot(x.astype(jnp.bfloat16), ff1_w_ref[l],
                     preferred_element_type=jnp.float32) + ff1_b_ref[l]
        # TODO(synk): HF BERT uses exact (erf) GELU; tanh-approx used here for
        # a guaranteed Mosaic lowering (exp/tanh on EUP).
        ff = jax.nn.gelu(ff, approximate=True)
        ff = jnp.dot(ff.astype(jnp.bfloat16), ff2_w_ref[l],
                     preferred_element_type=jnp.float32) + ff2_b_ref[l]
        x = _ln(x + ff, ln2_g_ref[l], ln2_b_ref[l])            # add + LN fused

    # Lane-dense padded probe (real labels occupy the first columns).
    logits = jnp.dot(x.astype(jnp.bfloat16), probe_w_ref[...],
                     preferred_element_type=jnp.float32) + probe_b_ref[...]
    out_ref[0] = logits


# ------------------------------ kernel wrapper -------------------------------

def _replicated_spec(arr):
    """Full-array block, same block for every grid step (weights)."""
    nd = arr.ndim
    return pl.BlockSpec(arr.shape, lambda b, _nd=nd: (0,) * _nd)


def fused_bert_forward(emb, params, cfg):
    """emb: (B, S, H) f32 -> padded logits (B, S, probe_pad) f32."""
    B, S, H = emb.shape
    P = cfg["probe_pad"]
    nh = cfg["heads"]
    dh = H // nh
    L = cfg["layers"]

    weight_args = (
        params["emb_ln_g"], params["emb_ln_b"],
        params["qkv_w"], params["qkv_b"], params["o_w"], params["o_b"],
        params["ln1_g"], params["ln1_b"],
        params["ff1_w"], params["ff1_b"], params["ff2_w"], params["ff2_b"],
        params["ln2_g"], params["ln2_b"],
        params["probe_w"], params["probe_b"],
    )

    kernel = functools.partial(_fused_bert_kernel, num_layers=L,
                               num_heads=nh, head_dim=dh, hidden=H)

    return pl.pallas_call(
        kernel,
        out_shape=jax.ShapeDtypeStruct((B, S, P), jnp.float32),
        grid=(B,),
        in_specs=[pl.BlockSpec((1, S, H), lambda b: (b, 0, 0))]
                 + [_replicated_spec(a) for a in weight_args],
        out_specs=pl.BlockSpec((1, S, P), lambda b: (b, 0, 0)),
        # B on the grid -> one sequence per TensorCore on v7x; sequential (and
        # cheap, weights are not re-DMA'd) on single-TC v5e/v6e.
        compiler_params=pltpu.CompilerParams(
            dimension_semantics=("parallel",)),
    )(emb, *weight_args)


# ------------------------------- model setup ---------------------------------

def init_params(key, cfg):
    H, I, nh, L = cfg["hidden"], cfg["intermediate"], cfg["heads"], cfg["layers"]
    dh = H // nh
    scale = 1.0 / math.sqrt(dh)

    def nrm(k, shape):
        return 0.02 * jax.random.normal(k, shape, dtype=jnp.float32)

    keys = iter(jax.random.split(key, 8 + 8 * L))

    params = {
        "word_emb": nrm(next(keys), (cfg["vocab"], H)),
        "pos_emb": nrm(next(keys), (cfg["max_pos"], H)),
        "type_emb": nrm(next(keys), (cfg["type_vocab"], H)),
        "emb_ln_g": jnp.ones((1, H), jnp.float32),
        "emb_ln_b": jnp.zeros((1, H), jnp.float32),
    }

    # Probe padded to probe_pad lanes; real labels occupy the first columns.
    probe_w = jnp.zeros((H, cfg["probe_pad"]), jnp.float32)
    probe_w = probe_w.at[:, : cfg["num_labels"]].set(
        nrm(next(keys), (H, cfg["num_labels"])))
    params["probe_w"] = probe_w.astype(jnp.bfloat16)
    params["probe_b"] = jnp.zeros((1, cfg["probe_pad"]), jnp.float32)

    qkv_w, qkv_b, o_w, o_b = [], [], [], []
    ln1_g, ln1_b, ff1_w, ff1_b = [], [], [], []
    ff2_w, ff2_b, ln2_g, ln2_b = [], [], [], []
    for _ in range(L):
        q_w = nrm(next(keys), (H, H))
        k_w = nrm(next(keys), (H, H))
        v_w = nrm(next(keys), (H, H))
        # Fused QKV projection; 1/sqrt(dh) folded into the Q columns.
        qkv_w.append(jnp.concatenate([q_w * scale, k_w, v_w], axis=1))
        qkv_b.append(jnp.zeros((1, 3 * H), jnp.float32))
        o_w.append(nrm(next(keys), (H, H)))
        o_b.append(jnp.zeros((1, H), jnp.float32))
        ln1_g.append(jnp.ones((1, H), jnp.float32))
        ln1_b.append(jnp.zeros((1, H), jnp.float32))
        ff1_w.append(nrm(next(keys), (H, I)))
        ff1_b.append(jnp.zeros((1, I), jnp.float32))
        ff2_w.append(nrm(next(keys), (I, H)))
        ff2_b.append(jnp.zeros((1, H), jnp.float32))
        ln2_g.append(jnp.ones((1, H), jnp.float32))
        ln2_b.append(jnp.zeros((1, H), jnp.float32))

    params.update(
        qkv_w=jnp.stack(qkv_w).astype(jnp.bfloat16),   # (L, H, 3H)
        qkv_b=jnp.stack(qkv_b),                        # (L, 1, 3H)
        o_w=jnp.stack(o_w).astype(jnp.bfloat16),       # (L, H, H)
        o_b=jnp.stack(o_b),                            # (L, 1, H)
        ln1_g=jnp.stack(ln1_g), ln1_b=jnp.stack(ln1_b),
        ff1_w=jnp.stack(ff1_w).astype(jnp.bfloat16),   # (L, H, I)
        ff1_b=jnp.stack(ff1_b),
        ff2_w=jnp.stack(ff2_w).astype(jnp.bfloat16),   # (L, I, H)
        ff2_b=jnp.stack(ff2_b),
        ln2_g=jnp.stack(ln2_g), ln2_b=jnp.stack(ln2_b),
    )
    return params


def linear_bert_forward(params, input_ids, cfg):
    """input_ids: (B, S) int32 token ids -> logits (B, S, num_labels)."""
    B, S = input_ids.shape
    token_type_ids = jnp.zeros_like(input_ids)

    # TODO(synk): embedding row-gathers stay in plain JAX (data-dependent
    # gather); could move into the kernel via PrefetchScalarGridSpec +
    # pl.Element row gather if this ever shows up in the profile.
    emb = (
        params["word_emb"][input_ids]
        + params["pos_emb"][jnp.arange(S)][None, :, :]
        + params["type_emb"][token_type_ids]
    ).astype(jnp.float32)                                   # (B, S, H)

    logits_padded = fused_bert_forward(emb, params, cfg)    # (B, S, probe_pad)
    return logits_padded[:, :, : cfg["num_labels"]]


# ---------------------------------- main -------------------------------------

if __name__ == "__main__":
    key = jax.random.PRNGKey(0)
    pkey, dkey = jax.random.split(key)

    params = init_params(pkey, CFG)

    B, S = 2, 8
    sentences = jax.random.randint(dkey, (B, S), 0, CFG["vocab"], dtype=jnp.int32)

    fwd = jax.jit(functools.partial(linear_bert_forward, cfg=CFG))
    logits = fwd(params, sentences)
    logits = jax.block_until_ready(logits)

    assert logits.shape == (B, S, CFG["num_labels"])
    assert bool(jnp.all(jnp.isfinite(logits)))
    print("KERNEL_OK")
</pallas_src>

<mosaic_0001>
module attributes {stable_mosaic.version = 11 : i64} {
  func.func @_fused_bert_kernel(%arg0: i32, %arg1: memref<1x8x128xf32, #tpu.memory_space<vmem>>, %arg2: memref<1x128xf32, #tpu.memory_space<vmem>>, %arg3: memref<1x128xf32, #tpu.memory_space<vmem>>, %arg4: memref<2x128x384xbf16, #tpu.memory_space<vmem>>, %arg5: memref<2x1x384xf32, #tpu.memory_space<vmem>>, %arg6: memref<2x128x128xbf16, #tpu.memory_space<vmem>>, %arg7: memref<2x1x128xf32, #tpu.memory_space<vmem>>, %arg8: memref<2x1x128xf32, #tpu.memory_space<vmem>>, %arg9: memref<2x1x128xf32, #tpu.memory_space<vmem>>, %arg10: memref<2x128x256xbf16, #tpu.memory_space<vmem>>, %arg11: memref<2x1x256xf32, #tpu.memory_space<vmem>>, %arg12: memref<2x256x128xbf16, #tpu.memory_space<vmem>>, %arg13: memref<2x1x128xf32, #tpu.memory_space<vmem>>, %arg14: memref<2x1x128xf32, #tpu.memory_space<vmem>>, %arg15: memref<2x1x128xf32, #tpu.memory_space<vmem>>, %arg16: memref<128x128xbf16, #tpu.memory_space<vmem>>, %arg17: memref<1x128xf32, #tpu.memory_space<vmem>>, %arg18: memref<1x8x128xf32, #tpu.memory_space<vmem>>) attributes {dimension_semantics = [#tpu.dimension_semantics<parallel>], iteration_bounds = array<i64: 2>, scalar_prefetch = 0 : i64, scratch_operands = 0 : i64, tpu.core_type = #tpu.core_type<tc>, window_params = [{transform_indices = @transform_0, window_bounds = array<i64: 1, 8, 128>}, {pipeline_mode = #tpu.pipeline_mode<synchronous>, transform_indices = @transform_1, window_bounds = array<i64: 1, 128>}, {pipeline_mode = #tpu.pipeline_mode<synchronous>, transform_indices = @transform_2, window_bounds = array<i64: 1, 128>}, {pipeline_mode = #tpu.pipeline_mode<synchronous>, transform_indices = @transform_3, window_bounds = array<i64: 2, 128, 384>}, {pipeline_mode = #tpu.pipeline_mode<synchronous>, transform_indices = @transform_4, window_bounds = array<i64: 2, 1, 384>}, {pipeline_mode = #tpu.pipeline_mode<synchronous>, transform_indices = @transform_5, window_bounds = array<i64: 2, 128, 128>}, {pipeline_mode = #tpu.pipeline_mode<synchronous>, transform_indices = @transform_6, window_bounds = array<i64: 2, 1, 128>}, {pipeline_mode = #tpu.pipeline_mode<synchronous>, transform_indices = @transform_7, window_bounds = array<i64: 2, 1, 128>}, {pipeline_mode = #tpu.pipeline_mode<synchronous>, transform_indices = @transform_8, window_bounds = array<i64: 2, 1, 128>}, {pipeline_mode = #tpu.pipeline_mode<synchronous>, transform_indices = @transform_9, window_bounds = array<i64: 2, 128, 256>}, {pipeline_mode = #tpu.pipeline_mode<synchronous>, transform_indices = @transform_10, window_bounds = array<i64: 2, 1, 256>}, {pipeline_mode = #tpu.pipeline_mode<synchronous>, transform_indices = @transform_11, window_bounds = array<i64: 2, 256, 128>}, {pipeline_mode = #tpu.pipeline_mode<synchronous>, transform_indices = @transform_12, window_bounds = array<i64: 2, 1, 128>}, {pipeline_mode = #tpu.pipeline_mode<synchronous>, transform_indices = @transform_13, window_bounds = array<i64: 2, 1, 128>}, {pipeline_mode = #tpu.pipeline_mode<synchronous>, transform_indices = @transform_14, window_bounds = array<i64: 2, 1, 128>}, {pipeline_mode = #tpu.pipeline_mode<synchronous>, transform_indices = @transform_15, window_bounds = array<i64: 128, 128>}, {pipeline_mode = #tpu.pipeline_mode<synchronous>, transform_indices = @transform_16, window_bounds = array<i64: 1, 128>}, {transform_indices = @transform_17, window_bounds = array<i64: 1, 8, 128>}]} {
    %c0 = arith.constant 0 : index
    %c0_0 = arith.constant 0 : index
    %c0_1 = arith.constant 0 : index
    %0 = vector.load %arg1[%c0, %c0_0, %c0_1] : memref<1x8x128xf32, #tpu.memory_space<vmem>>, vector<1x8x128xf32>
    %1 = vector.shape_cast %0 : vector<1x8x128xf32> to vector<8x128xf32>
    %c0_2 = arith.constant 0 : index
    %c0_3 = arith.constant 0 : index
    %2 = vector.load %arg2[%c0_2, %c0_3] : memref<1x128xf32, #tpu.memory_space<vmem>>, vector<1x128xf32>
    %c0_4 = arith.constant 0 : index
    %c0_5 = arith.constant 0 : index
    %3 = vector.load %arg3[%c0_4, %c0_5] : memref<1x128xf32, #tpu.memory_space<vmem>>, vector<1x128xf32>
    %cst = arith.constant dense<0.000000e+00> : vector<8xf32>
    %4 = vector.multi_reduction <add>, %1, %cst [1] : vector<8x128xf32> to vector<8xf32>
    %5 = vector.shape_cast %4 : vector<8xf32> to vector<8x1xf32>
    %cst_6 = arith.constant 1.280000e+02 : f32
    %6 = vector.broadcast %cst_6 : f32 to vector<8x1xf32>
    %7 = arith.divf %5, %6 : vector<8x1xf32>
    %8 = vector.broadcast %7 : vector<8x1xf32> to vector<8x128xf32>
    %9 = arith.subf %1, %8 : vector<8x128xf32>
    %10 = arith.mulf %9, %9 : vector<8x128xf32>
    %cst_7 = arith.constant dense<0.000000e+00> : vector<8xf32>
    %11 = vector.multi_reduction <add>, %10, %cst_7 [1] : vector<8x128xf32> to vector<8xf32>
    %12 = vector.shape_cast %11 : vector<8xf32> to vector<8x1xf32>
    %cst_8 = arith.constant 1.280000e+02 : f32
    %13 = vector.broadcast %cst_8 : f32 to vector<8x1xf32>
    %14 = arith.divf %12, %13 : vector<8x1xf32>
    %cst_9 = arith.constant 9.99999996E-13 : f32
    %15 = vector.broadcast %cst_9 : f32 to vector<8x1xf32>
    %16 = arith.addf %14, %15 : vector<8x1xf32>
    %17 = math.rsqrt %16 : vector<8x1xf32>
    %18 = vector.broadcast %17 : vector<8x1xf32> to vector<8x128xf32>
    %19 = arith.mulf %9, %18 : vector<8x128xf32>
    %20 = vector.broadcast %2 : vector<1x128xf32> to vector<8x128xf32>
    %21 = arith.mulf %19, %20 : vector<8x128xf32>
    %22 = vector.broadcast %3 : vector<1x128xf32> to vector<8x128xf32>
    %23 = arith.addf %21, %22 : vector<8x128xf32>
    %24 = arith.truncf %23 : vector<8x128xf32> to vector<8x128xbf16>
    %c0_10 = arith.constant 0 : index
    %c0_11 = arith.constant 0 : index
    %c0_12 = arith.constant 0 : index
    %25 = vector.load %arg4[%c0_10, %c0_11, %c0_12] : memref<2x128x384xbf16, #tpu.memory_space<vmem>>, vector<1x128x384xbf16>
    %26 = vector.shape_cast %25 : vector<1x128x384xbf16> to vector<128x384xbf16>
    %cst_13 = arith.constant dense<0.000000e+00> : vector<8x384xf32>
    %27 = tpu.matmul %24, %26, %cst_13 {dimension_numbers = #tpu.dot_dimension_numbers<[1], [0], [0], [1], [0, 0, 1, 1], [], []>} : vector<8x128xbf16>, vector<128x384xbf16>, vector<8x384xf32> -> vector<8x384xf32>
    %c0_14 = arith.constant 0 : index
    %c0_15 = arith.constant 0 : index
    %c0_16 = arith.constant 0 : index
    %28 = vector.load %arg5[%c0_14, %c0_15, %c0_16] : memref<2x1x384xf32, #tpu.memory_space<vmem>>, vector<1x1x384xf32>
    %29 = vector.shape_cast %28 : vector<1x1x384xf32> to vector<1x384xf32>
    %30 = vector.broadcast %29 : vector<1x384xf32> to vector<8x384xf32>
    %31 = arith.addf %27, %30 : vector<8x384xf32>
    %32 = arith.truncf %31 : vector<8x384xf32> to vector<8x384xbf16>
    %33 = vector.extract_strided_slice %32 {offsets = [0, 0], sizes = [8, 64], strides = [1, 1]} : vector<8x384xbf16> to vector<8x64xbf16>
    %34 = vector.extract_strided_slice %32 {offsets = [0, 128], sizes = [8, 64], strides = [1, 1]} : vector<8x384xbf16> to vector<8x64xbf16>
    %35 = vector.extract_strided_slice %32 {offsets = [0, 256], sizes = [8, 64], strides = [1, 1]} : vector<8x384xbf16> to vector<8x64xbf16>
    %36 = vector.extract_strided_slice %32 {offsets = [0, 64], sizes = [8, 64], strides = [1, 1]} : vector<8x384xbf16> to vector<8x64xbf16>
    %37 = vector.extract_strided_slice %32 {offsets = [0, 192], sizes = [8, 64], strides = [1, 1]} : vector<8x384xbf16> to vector<8x64xbf16>
    %38 = vector.extract_strided_slice %32 {offsets = [0, 320], sizes = [8, 64], strides = [1, 1]} : vector<8x384xbf16> to vector<8x64xbf16>
    %39 = vector.shape_cast %33 : vector<8x64xbf16> to vector<1x8x64xbf16>
    %40 = vector.shape_cast %36 : vector<8x64xbf16> to vector<1x8x64xbf16>
    %41 = tpu.concatenate %39, %40 in 0 : vector<1x8x64xbf16>, vector<1x8x64xbf16> -> vector<2x8x64xbf16>
    %42 = vector.shape_cast %34 : vector<8x64xbf16> to vector<1x8x64xbf16>
    %43 = vector.shape_cast %37 : vector<8x64xbf16> to vector<1x8x64xbf16>
    %44 = tpu.concatenate %42, %43 in 0 : vector<1x8x64xbf16>, vector<1x8x64xbf16> -> vector<2x8x64xbf16>
    %45 = vector.shape_cast %35 : vector<8x64xbf16> to vector<1x8x64xbf16>
    %46 = vector.shape_cast %38 : vector<8x64xbf16> to vector<1x8x64xbf16>
    %47 = tpu.concatenate %45, %46 in 0 : vector<1x8x64xbf16>, vector<1x8x64xbf16> -> vector<2x8x64xbf16>
    "tpu.trace_start"() <{level = 10 : i32, message = "hqd,hkd->hqk"}> : () -> ()
    %cst_17 = arith.constant dense<0.000000e+00> : vector<2x8x8xf32>
    %48 = tpu.matmul %41, %44, %cst_17 {dimension_numbers = #tpu.dot_dimension_numbers<[2], [2], [1], [1], [0, 0, 0, 1, 1, 1], [0], [0]>} : vector<2x8x64xbf16>, vector<2x8x64xbf16>, vector<2x8x8xf32> -> vector<2x8x8xf32>
    "tpu.trace_stop"() : () -> ()
    %cst_18 = arith.constant dense<0xFF800000> : vector<2x8xf32>
    %49 = vector.multi_reduction <maximumf>, %48, %cst_18 [2] : vector<2x8x8xf32> to vector<2x8xf32>
    %50 = vector.shape_cast %49 : vector<2x8xf32> to vector<2x8x1xf32>
    %51 = vector.broadcast %50 : vector<2x8x1xf32> to vector<2x8x8xf32>
    %52 = arith.subf %48, %51 : vector<2x8x8xf32>
    %53 = math.exp %52 : vector<2x8x8xf32>
    %cst_19 = arith.constant dense<0.000000e+00> : vector<2x8xf32>
    %54 = vector.multi_reduction <add>, %53, %cst_19 [2] : vector<2x8x8xf32> to vector<2x8xf32>
    %55 = vector.shape_cast %54 : vector<2x8xf32> to vector<2x8x1xf32>
    %56 = tpu.reciprocal %55 {approx = true} : vector<2x8x1xf32> -> vector<2x8x1xf32>
    %57 = vector.broadcast %56 : vector<2x8x1xf32> to vector<2x8x8xf32>
    %58 = arith.mulf %53, %57 : vector<2x8x8xf32>
    %59 = arith.truncf %58 : vector<2x8x8xf32> to vector<2x8x8xbf16>
    "tpu.trace_start"() <{level = 10 : i32, message = "hqk,hkd->hqd"}> : () -> ()
    %cst_20 = arith.constant dense<0.000000e+00> : vector<2x8x64xf32>
    %60 = tpu.matmul %59, %47, %cst_20 {dimension_numbers = #tpu.dot_dimension_numbers<[2], [1], [1], [2], [0, 0, 0, 1, 1, 2], [0], [0]>} : vector<2x8x8xbf16>, vector<2x8x64xbf16>, vector<2x8x64xf32> -> vector<2x8x64xf32>
    "tpu.trace_stop"() : () -> ()
    %61 = vector.extract_strided_slice %60 {offsets = [0, 0, 0], sizes = [1, 8, 64], strides = [1, 1, 1]} : vector<2x8x64xf32> to vector<1x8x64xf32>
    %62 = vector.shape_cast %61 : vector<1x8x64xf32> to vector<8x64xf32>
    %63 = vector.extract_strided_slice %60 {offsets = [1, 0, 0], sizes = [1, 8, 64], strides = [1, 1, 1]} : vector<2x8x64xf32> to vector<1x8x64xf32>
    %64 = vector.shape_cast %63 : vector<1x8x64xf32> to vector<8x64xf32>
    %65 = tpu.concatenate %62, %64 in 1 : vector<8x64xf32>, vector<8x64xf32> -> vector<8x128xf32>
    %66 = arith.truncf %65 : vector<8x128xf32> to vector<8x128xbf16>
    %c0_21 = arith.constant 0 : index
    %c0_22 = arith.constant 0 : index
    %c0_23 = arith.constant 0 : index
    %67 = vector.load %arg6[%c0_21, %c0_22, %c0_23] : memref<2x128x128xbf16, #tpu.memory_space<vmem>>, vector<1x128x128xbf16>
    %68 = vector.shape_cast %67 : vector<1x128x128xbf16> to vector<128x128xbf16>
    %cst_24 = arith.constant dense<0.000000e+00> : vector<8x128xf32>
    %69 = tpu.matmul %66, %68, %cst_24 {dimension_numbers = #tpu.dot_dimension_numbers<[1], [0], [0], [1], [0, 0, 1, 1], [], []>} : vector<8x128xbf16>, vector<128x128xbf16>, vector<8x128xf32> -> vector<8x128xf32>
    %c0_25 = arith.constant 0 : index
    %c0_26 = arith.constant 0 : index
    %c0_27 = arith.constant 0 : index
    %70 = vector.load %arg7[%c0_25, %c0_26, %c0_27] : memref<2x1x128xf32, #tpu.memory_space<vmem>>, vector<1x1x128xf32>
    %71 = vector.shape_cast %70 : vector<1x1x128xf32> to vector<1x128xf32>
    %72 = vector.broadcast %71 : vector<1x128xf32> to vector<8x128xf32>
    %73 = arith.addf %69, %72 : vector<8x128xf32>
    %74 = arith.addf %23, %73 : vector<8x128xf32>
    %c0_28 = arith.constant 0 : index
    %c0_29 = arith.constant 0 : index
    %c0_30 = arith.constant 0 : index
    %75 = vector.load %arg8[%c0_28, %c0_29, %c0_30] : memref<2x1x128xf32, #tpu.memory_space<vmem>>, vector<1x1x128xf32>
    %76 = vector.shape_cast %75 : vector<1x1x128xf32> to vector<1x128xf32>
    %c0_31 = arith.constant 0 : index
    %c0_32 = arith.constant 0 : index
    %c0_33 = arith.constant 0 : index
    %77 = vector.load %arg9[%c0_31, %c0_32, %c0_33] : memref<2x1x128xf32, #tpu.memory_space<vmem>>, vector<1x1x128xf32>
    %78 = vector.shape_cast %77 : vector<1x1x128xf32> to vector<1x128xf32>
    %cst_34 = arith.constant dense<0.000000e+00> : vector<8xf32>
    %79 = vector.multi_reduction <add>, %74, %cst_34 [1] : vector<8x128xf32> to vector<8xf32>
    %80 = vector.shape_cast %79 : vector<8xf32> to vector<8x1xf32>
    %cst_35 = arith.constant 1.280000e+02 : f32
    %81 = vector.broadcast %cst_35 : f32 to vector<8x1xf32>
    %82 = arith.divf %80, %81 : vector<8x1xf32>
    %83 = vector.broadcast %82 : vector<8x1xf32> to vector<8x128xf32>
    %84 = arith.subf %74, %83 : vector<8x128xf32>
    %85 = arith.mulf %84, %84 : vector<8x128xf32>
    %cst_36 = arith.constant dense<0.000000e+00> : vector<8xf32>
    %86 = vector.multi_reduction <add>, %85, %cst_36 [1] : vector<8x128xf32> to vector<8xf32>
    %87 = vector.shape_cast %86 : vector<8xf32> to vector<8x1xf32>
    %cst_37 = arith.constant 1.280000e+02 : f32
    %88 = vector.broadcast %cst_37 : f32 to vector<8x1xf32>
    %89 = arith.divf %87, %88 : vector<8x1xf32>
    %cst_38 = arith.constant 9.99999996E-13 : f32
    %90 = vector.broadcast %cst_38 : f32 to vector<8x1xf32>
    %91 = arith.addf %89, %90 : vector<8x1xf32>
    %92 = math.rsqrt %91 : vector<8x1xf32>
    %93 = vector.broadcast %92 : vector<8x1xf32> to vector<8x128xf32>
    %94 = arith.mulf %84, %93 : vector<8x128xf32>
    %95 = vector.broadcast %76 : vector<1x128xf32> to vector<8x128xf32>
    %96 = arith.mulf %94, %95 : vector<8x128xf32>
    %97 = vector.broadcast %78 : vector<1x128xf32> to vector<8x128xf32>
    %98 = arith.addf %96, %97 : vector<8x128xf32>
    %99 = arith.truncf %98 : vector<8x128xf32> to vector<8x128xbf16>
    %c0_39 = arith.constant 0 : index
    %c0_40 = arith.constant 0 : index
    %c0_41 = arith.constant 0 : index
    %100 = vector.load %arg10[%c0_39, %c0_40, %c0_41] : memref<2x128x256xbf16, #tpu.memory_space<vmem>>, vector<1x128x256xbf16>
    %101 = vector.shape_cast %100 : vector<1x128x256xbf16> to vector<128x256xbf16>
    %cst_42 = arith.constant dense<0.000000e+00> : vector<8x256xf32>
    %102 = tpu.matmul %99, %101, %cst_42 {dimension_numbers = #tpu.dot_dimension_numbers<[1], [0], [0], [1], [0, 0, 1, 1], [], []>} : vector<8x128xbf16>, vector<128x256xbf16>, vector<8x256xf32> -> vector<8x256xf32>
    %c0_43 = arith.constant 0 : index
    %c0_44 = arith.constant 0 : index
    %c0_45 = arith.constant 0 : index
    %103 = vector.load %arg11[%c0_43, %c0_44, %c0_45] : memref<2x1x256xf32, #tpu.memory_space<vmem>>, vector<1x1x256xf32>
    %104 = vector.shape_cast %103 : vector<1x1x256xf32> to vector<1x256xf32>
    %105 = vector.broadcast %104 : vector<1x256xf32> to vector<8x256xf32>
    %106 = arith.addf %102, %105 : vector<8x256xf32>
    %107 = arith.mulf %106, %106 : vector<8x256xf32>
    %108 = arith.mulf %106, %107 : vector<8x256xf32>
    %cst_46 = arith.constant 4.471500e-02 : f32
    %109 = vector.broadcast %cst_46 : f32 to vector<8x256xf32>
    %110 = arith.mulf %109, %108 : vector<8x256xf32>
    %111 = arith.addf %106, %110 : vector<8x256xf32>
    %cst_47 = arith.constant 0.797884583 : f32
    %112 = vector.broadcast %cst_47 : f32 to vector<8x256xf32>
    %113 = arith.mulf %112, %111 : vector<8x256xf32>
    %114 = math.tanh %113 : vector<8x256xf32>
    %cst_48 = arith.constant 1.000000e+00 : f32
    %115 = vector.broadcast %cst_48 : f32 to vector<8x256xf32>
    %116 = arith.addf %115, %114 : vector<8x256xf32>
    %cst_49 = arith.constant 5.000000e-01 : f32
    %117 = vector.broadcast %cst_49 : f32 to vector<8x256xf32>
    %118 = arith.mulf %117, %116 : vector<8x256xf32>
    %119 = arith.mulf %106, %118 : vector<8x256xf32>
    %120 = arith.truncf %119 : vector<8x256xf32> to vector<8x256xbf16>
    %c0_50 = arith.constant 0 : index
    %c0_51 = arith.constant 0 : index
    %c0_52 = arith.constant 0 : index
    %121 = vector.load %arg12[%c0_50, %c0_51, %c0_52] : memref<2x256x128xbf16, #tpu.memory_space<vmem>>, vector<1x256x128xbf16>
    %122 = vector.shape_cast %121 : vector<1x256x128xbf16> to vector<256x128xbf16>
    %cst_53 = arith.constant dense<0.000000e+00> : vector<8x128xf32>
    %123 = tpu.matmul %120, %122, %cst_53 {dimension_numbers = #tpu.dot_dimension_numbers<[1], [0], [0], [1], [0, 0, 1, 1], [], []>} : vector<8x256xbf16>, vector<256x128xbf16>, vector<8x128xf32> -> vector<8x128xf32>
    %c0_54 = arith.constant 0 : index
    %c0_55 = arith.constant 0 : index
    %c0_56 = arith.constant 0 : index
    %124 = vector.load %arg13[%c0_54, %c0_55, %c0_56] : memref<2x1x128xf32, #tpu.memory_space<vmem>>, vector<1x1x128xf32>
    %125 = vector.shape_cast %124 : vector<1x1x128xf32> to vector<1x128xf32>
    %126 = vector.broadcast %125 : vector<1x128xf32> to vector<8x128xf32>
    %127 = arith.addf %123, %126 : vector<8x128xf32>
    %128 = arith.addf %98, %127 : vector<8x128xf32>
    %c0_57 = arith.constant 0 : index
    %c0_58 = arith.constant 0 : index
    %c0_59 = arith.constant 0 : index
    %129 = vector.load %arg14[%c0_57, %c0_58, %c0_59] : memref<2x1x128xf32, #tpu.memory_space<vmem>>, vector<1x1x128xf32>
    %130 = vector.shape_cast %129 : vector<1x1x128xf32> to vector<1x128xf32>
    %c0_60 = arith.constant 0 : index
    %c0_61 = arith.constant 0 : index
    %c0_62 = arith.constant 0 : index
    %131 = vector.load %arg15[%c0_60, %c0_61, %c0_62] : memref<2x1x128xf32, #tpu.memory_space<vmem>>, vector<1x1x128xf32>
    %132 = vector.shape_cast %131 : vector<1x1x128xf32> to vector<1x128xf32>
    %cst_63 = arith.constant dense<0.000000e+00> : vector<8xf32>
    %133 = vector.multi_reduction <add>, %128, %cst_63 [1] : vector<8x128xf32> to vector<8xf32>
    %134 = vector.shape_cast %133 : vector<8xf32> to vector<8x1xf32>
    %cst_64 = arith.constant 1.280000e+02 : f32
    %135 = vector.broadcast %cst_64 : f32 to vector<8x1xf32>
    %136 = arith.divf %134, %135 : vector<8x1xf32>
    %137 = vector.broadcast %136 : vector<8x1xf32> to vector<8x128xf32>
    %138 = arith.subf %128, %137 : vector<8x128xf32>
    %139 = arith.mulf %138, %138 : vector<8x128xf32>
    %cst_65 = arith.constant dense<0.000000e+00> : vector<8xf32>
    %140 = vector.multi_reduction <add>, %139, %cst_65 [1] : vector<8x128xf32> to vector<8xf32>
    %141 = vector.shape_cast %140 : vector<8xf32> to vector<8x1xf32>
    %cst_66 = arith.constant 1.280000e+02 : f32
    %142 = vector.broadcast %cst_66 : f32 to vector<8x1xf32>
    %143 = arith.divf %141, %142 : vector<8x1xf32>
    %cst_67 = arith.constant 9.99999996E-13 : f32
    %144 = vector.broadcast %cst_67 : f32 to vector<8x1xf32>
    %145 = arith.addf %143, %144 : vector<8x1xf32>
    %146 = math.rsqrt %145 : vector<8x1xf32>
    %147 = vector.broadcast %146 : vector<8x1xf32> to vector<8x128xf32>
    %148 = arith.mulf %138, %147 : vector<8x128xf32>
    %149 = vector.broadcast %130 : vector<1x128xf32> to vector<8x128xf32>
    %150 = arith.mulf %148, %149 : vector<8x128xf32>
    %151 = vector.broadcast %132 : vector<1x128xf32> to vector<8x128xf32>
    %152 = arith.addf %150, %151 : vector<8x128xf32>
    %153 = arith.truncf %152 : vector<8x128xf32> to vector<8x128xbf16>
    %c1 = arith.constant 1 : index
    %c0_68 = arith.constant 0 : index
    %c0_69 = arith.constant 0 : index
    %154 = vector.load %arg4[%c1, %c0_68, %c0_69] : memref<2x128x384xbf16, #tpu.memory_space<vmem>>, vector<1x128x384xbf16>
    %155 = vector.shape_cast %154 : vector<1x128x384xbf16> to vector<128x384xbf16>
    %cst_70 = arith.constant dense<0.000000e+00> : vector<8x384xf32>
    %156 = tpu.matmul %153, %155, %cst_70 {dimension_numbers = #tpu.dot_dimension_numbers<[1], [0], [0], [1], [0, 0, 1, 1], [], []>} : vector<8x128xbf16>, vector<128x384xbf16>, vector<8x384xf32> -> vector<8x384xf32>
    %c1_71 = arith.constant 1 : index
    %c0_72 = arith.constant 0 : index
    %c0_73 = arith.constant 0 : index
    %157 = vector.load %arg5[%c1_71, %c0_72, %c0_73] : memref<2x1x384xf32, #tpu.memory_space<vmem>>, vector<1x1x384xf32>
    %158 = vector.shape_cast %157 : vector<1x1x384xf32> to vector<1x384xf32>
    %159 = vector.broadcast %158 : vector<1x384xf32> to vector<8x384xf32>
    %160 = arith.addf %156, %159 : vector<8x384xf32>
    %161 = arith.truncf %160 : vector<8x384xf32> to vector<8x384xbf16>
    %162 = vector.extract_strided_slice %161 {offsets = [0, 0], sizes = [8, 64], strides = [1, 1]} : vector<8x384xbf16> to vector<8x64xbf16>
    %163 = vector.extract_strided_slice %161 {offsets = [0, 128], sizes = [8, 64], strides = [1, 1]} : vector<8x384xbf16> to vector<8x64xbf16>
    %164 = vector.extract_strided_slice %161 {offsets = [0, 256], sizes = [8, 64], strides = [1, 1]} : vector<8x384xbf16> to vector<8x64xbf16>
    %165 = vector.extract_strided_slice %161 {offsets = [0, 64], sizes = [8, 64], strides = [1, 1]} : vector<8x384xbf16> to vector<8x64xbf16>
    %166 = vector.extract_strided_slice %161 {offsets = [0, 192], sizes = [8, 64], strides = [1, 1]} : vector<8x384xbf16> to vector<8x64xbf16>
    %167 = vector.extract_strided_slice %161 {offsets = [0, 320], sizes = [8, 64], strides = [1, 1]} : vector<8x384xbf16> to vector<8x64xbf16>
    %168 = vector.shape_cast %162 : vector<8x64xbf16> to vector<1x8x64xbf16>
    %169 = vector.shape_cast %165 : vector<8x64xbf16> to vector<1x8x64xbf16>
    %170 = tpu.concatenate %168, %169 in 0 : vector<1x8x64xbf16>, vector<1x8x64xbf16> -> vector<2x8x64xbf16>
    %171 = vector.shape_cast %163 : vector<8x64xbf16> to vector<1x8x64xbf16>
    %172 = vector.shape_cast %166 : vector<8x64xbf16> to vector<1x8x64xbf16>
    %173 = tpu.concatenate %171, %172 in 0 : vector<1x8x64xbf16>, vector<1x8x64xbf16> -> vector<2x8x64xbf16>
    %174 = vector.shape_cast %164 : vector<8x64xbf16> to vector<1x8x64xbf16>
    %175 = vector.shape_cast %167 : vector<8x64xbf16> to vector<1x8x64xbf16>
    %176 = tpu.concatenate %174, %175 in 0 : vector<1x8x64xbf16>, vector<1x8x64xbf16> -> vector<2x8x64xbf16>
    "tpu.trace_start"() <{level = 10 : i32, message = "hqd,hkd->hqk"}> : () -> ()
    %cst_74 = arith.constant dense<0.000000e+00> : vector<2x8x8xf32>
    %177 = tpu.matmul %170, %173, %cst_74 {dimension_numbers = #tpu.dot_dimension_numbers<[2], [2], [1], [1], [0, 0, 0, 1, 1, 1], [0], [0]>} : vector<2x8x64xbf16>, vector<2x8x64xbf16>, vector<2x8x8xf32> -> vector<2x8x8xf32>
    "tpu.trace_stop"() : () -> ()
    %cst_75 = arith.constant dense<0xFF800000> : vector<2x8xf32>
    %178 = vector.multi_reduction <maximumf>, %177, %cst_75 [2] : vector<2x8x8xf32> to vector<2x8xf32>
    %179 = vector.shape_cast %178 : vector<2x8xf32> to vector<2x8x1xf32>
    %180 = vector.broadcast %179 : vector<2x8x1xf32> to vector<2x8x8xf32>
    %181 = arith.subf %177, %180 : vector<2x8x8xf32>
    %182 = math.exp %181 : vector<2x8x8xf32>
    %cst_76 = arith.constant dense<0.000000e+00> : vector<2x8xf32>
    %183 = vector.multi_reduction <add>, %182, %cst_76 [2] : vector<2x8x8xf32> to vector<2x8xf32>
    %184 = vector.shape_cast %183 : vector<2x8xf32> to vector<2x8x1xf32>
    %185 = tpu.reciprocal %184 {approx = true} : vector<2x8x1xf32> -> vector<2x8x1xf32>
    %186 = vector.broadcast %185 : vector<2x8x1xf32> to vector<2x8x8xf32>
    %187 = arith.mulf %182, %186 : vector<2x8x8xf32>
    %188 = arith.truncf %187 : vector<2x8x8xf32> to vector<2x8x8xbf16>
    "tpu.trace_start"() <{level = 10 : i32, message = "hqk,hkd->hqd"}> : () -> ()
    %cst_77 = arith.constant dense<0.000000e+00> : vector<2x8x64xf32>
    %189 = tpu.matmul %188, %176, %cst_77 {dimension_numbers = #tpu.dot_dimension_numbers<[2], [1], [1], [2], [0, 0, 0, 1, 1, 2], [0], [0]>} : vector<2x8x8xbf16>, vector<2x8x64xbf16>, vector<2x8x64xf32> -> vector<2x8x64xf32>
    "tpu.trace_stop"() : () -> ()
    %190 = vector.extract_strided_slice %189 {offsets = [0, 0, 0], sizes = [1, 8, 64], strides = [1, 1, 1]} : vector<2x8x64xf32> to vector<1x8x64xf32>
    %191 = vector.shape_cast %190 : vector<1x8x64xf32> to vector<8x64xf32>
    %192 = vector.extract_strided_slice %189 {offsets = [1, 0, 0], sizes = [1, 8, 64], strides = [1, 1, 1]} : vector<2x8x64xf32> to vector<1x8x64xf32>
    %193 = vector.shape_cast %192 : vector<1x8x64xf32> to vector<8x64xf32>
    %194 = tpu.concatenate %191, %193 in 1 : vector<8x64xf32>, vector<8x64xf32> -> vector<8x128xf32>
    %195 = arith.truncf %194 : vector<8x128xf32> to vector<8x128xbf16>
    %c1_78 = arith.constant 1 : index
    %c0_79 = arith.constant 0 : index
    %c0_80 = arith.constant 0 : index
    %196 = vector.load %arg6[%c1_78, %c0_79, %c0_80] : memref<2x128x128xbf16, #tpu.memory_space<vmem>>, vector<1x128x128xbf16>
    %197 = vector.shape_cast %196 : vector<1x128x128xbf16> to vector<128x128xbf16>
    %cst_81 = arith.constant dense<0.000000e+00> : vector<8x128xf32>
    %198 = tpu.matmul %195, %197, %cst_81 {dimension_numbers = #tpu.dot_dimension_numbers<[1], [0], [0], [1], [0, 0, 1, 1], [], []>} : vector<8x128xbf16>, vector<128x128xbf16>, vector<8x128xf32> -> vector<8x128xf32>
    %c1_82 = arith.constant 1 : index
    %c0_83 = arith.constant 0 : index
    %c0_84 = arith.constant 0 : index
    %199 = vector.load %arg7[%c1_82, %c0_83, %c0_84] : memref<2x1x128xf32, #tpu.memory_space<vmem>>, vector<1x1x128xf32>
    %200 = vector.shape_cast %199 : vector<1x1x128xf32> to vector<1x128xf32>
    %201 = vector.broadcast %200 : vector<1x128xf32> to vector<8x128xf32>
    %202 = arith.addf %198, %201 : vector<8x128xf32>
    %203 = arith.addf %152, %202 : vector<8x128xf32>
    %c1_85 = arith.constant 1 : index
    %c0_86 = arith.constant 0 : index
    %c0_87 = arith.constant 0 : index
    %204 = vector.load %arg8[%c1_85, %c0_86, %c0_87] : memref<2x1x128xf32, #tpu.memory_space<vmem>>, vector<1x1x128xf32>
    %205 = vector.shape_cast %204 : vector<1x1x128xf32> to vector<1x128xf32>
    %c1_88 = arith.constant 1 : index
    %c0_89 = arith.constant 0 : index
    %c0_90 = arith.constant 0 : index
    %206 = vector.load %arg9[%c1_88, %c0_89, %c0_90] : memref<2x1x128xf32, #tpu.memory_space<vmem>>, vector<1x1x128xf32>
    %207 = vector.shape_cast %206 : vector<1x1x128xf32> to vector<1x128xf32>
    %cst_91 = arith.constant dense<0.000000e+00> : vector<8xf32>
    %208 = vector.multi_reduction <add>, %203, %cst_91 [1] : vector<8x128xf32> to vector<8xf32>
    %209 = vector.shape_cast %208 : vector<8xf32> to vector<8x1xf32>
    %cst_92 = arith.constant 1.280000e+02 : f32
    %210 = vector.broadcast %cst_92 : f32 to vector<8x1xf32>
    %211 = arith.divf %209, %210 : vector<8x1xf32>
    %212 = vector.broadcast %211 : vector<8x1xf32> to vector<8x128xf32>
    %213 = arith.subf %203, %212 : vector<8x128xf32>
    %214 = arith.mulf %213, %213 : vector<8x128xf32>
    %cst_93 = arith.constant dense<0.000000e+00> : vector<8xf32>
    %215 = vector.multi_reduction <add>, %214, %cst_93 [1] : vector<8x128xf32> to vector<8xf32>
    %216 = vector.shape_cast %215 : vector<8xf32> to vector<8x1xf32>
    %cst_94 = arith.constant 1.280000e+02 : f32
    %217 = vector.broadcast %cst_94 : f32 to vector<8x1xf32>
    %218 = arith.divf %216, %217 : vector<8x1xf32>
    %cst_95 = arith.constant 9.99999996E-13 : f32
    %219 = vector.broadcast %cst_95 : f32 to vector<8x1xf32>
    %220 = arith.addf %218, %219 : vector<8x1xf32>
    %221 = math.rsqrt %220 : vector<8x1xf32>
    %222 = vector.broadcast %221 : vector<8x1xf32> to vector<8x128xf32>
    %223 = arith.mulf %213, %222 : vector<8x128xf32>
    %224 = vector.broadcast %205 : vector<1x128xf32> to vector<8x128xf32>
    %225 = arith.mulf %223, %224 : vector<8x128xf32>
    %226 = vector.broadcast %207 : vector<1x128xf32> to vector<8x128xf32>
    %227 = arith.addf %225, %226 : vector<8x128xf32>
    %228 = arith.truncf %227 : vector<8x128xf32> to vector<8x128xbf16>
    %c1_96 = arith.constant 1 : index
    %c0_97 = arith.constant 0 : index
    %c0_98 = arith.constant 0 : index
    %229 = vector.load %arg10[%c1_96, %c0_97, %c0_98] : memref<2x128x256xbf16, #tpu.memory_space<vmem>>, vector<1x128x256xbf16>
    %230 = vector.shape_cast %229 : vector<1x128x256xbf16> to vector<128x256xbf16>
    %cst_99 = arith.constant dense<0.000000e+00> : vector<8x256xf32>
    %231 = tpu.matmul %228, %230, %cst_99 {dimension_numbers = #tpu.dot_dimension_numbers<[1], [0], [0], [1], [0, 0, 1, 1], [], []>} : vector<8x128xbf16>, vector<128x256xbf16>, vector<8x256xf32> -> vector<8x256xf32>
    %c1_100 = arith.constant 1 : index
    %c0_101 = arith.constant 0 : index
    %c0_102 = arith.constant 0 : index
    %232 = vector.load %arg11[%c1_100, %c0_101, %c0_102] : memref<2x1x256xf32, #tpu.memory_space<vmem>>, vector<1x1x256xf32>
    %233 = vector.shape_cast %232 : vector<1x1x256xf32> to vector<1x256xf32>
    %234 = vector.broadcast %233 : vector<1x256xf32> to vector<8x256xf32>
    %235 = arith.addf %231, %234 : vector<8x256xf32>
    %236 = arith.mulf %235, %235 : vector<8x256xf32>
    %237 = arith.mulf %235, %236 : vector<8x256xf32>
    %cst_103 = arith.constant 4.471500e-02 : f32
    %238 = vector.broadcast %cst_103 : f32 to vector<8x256xf32>
    %239 = arith.mulf %238, %237 : vector<8x256xf32>
    %240 = arith.addf %235, %239 : vector<8x256xf32>
    %cst_104 = arith.constant 0.797884583 : f32
    %241 = vector.broadcast %cst_104 : f32 to vector<8x256xf32>
    %242 = arith.mulf %241, %240 : vector<8x256xf32>
    %243 = math.tanh %242 : vector<8x256xf32>
    %cst_105 = arith.constant 1.000000e+00 : f32
    %244 = vector.broadcast %cst_105 : f32 to vector<8x256xf32>
    %245 = arith.addf %244, %243 : vector<8x256xf32>
    %cst_106 = arith.constant 5.000000e-01 : f32
    %246 = vector.broadcast %cst_106 : f32 to vector<8x256xf32>
    %247 = arith.mulf %246, %245 : vector<8x256xf32>
    %248 = arith.mulf %235, %247 : vector<8x256xf32>
    %249 = arith.truncf %248 : vector<8x256xf32> to vector<8x256xbf16>
    %c1_107 = arith.constant 1 : index
    %c0_108 = arith.constant 0 : index
    %c0_109 = arith.constant 0 : index
    %250 = vector.load %arg12[%c1_107, %c0_108, %c0_109] : memref<2x256x128xbf16, #tpu.memory_space<vmem>>, vector<1x256x128xbf16>
    %251 = vector.shape_cast %250 : vector<1x256x128xbf16> to vector<256x128xbf16>
    %cst_110 = arith.constant dense<0.000000e+00> : vector<8x128xf32>
    %252 = tpu.matmul %249, %251, %cst_110 {dimension_numbers = #tpu.dot_dimension_numbers<[1], [0], [0], [1], [0, 0, 1, 1], [], []>} : vector<8x256xbf16>, vector<256x128xbf16>, vector<8x128xf32> -> vector<8x128xf32>
    %c1_111 = arith.constant 1 : index
    %c0_112 = arith.constant 0 : index
    %c0_113 = arith.constant 0 : index
    %253 = vector.load %arg13[%c1_111, %c0_112, %c0_113] : memref<2x1x128xf32, #tpu.memory_space<vmem>>, vector<1x1x128xf32>
    %254 = vector.shape_cast %253 : vector<1x1x128xf32> to vector<1x128xf32>
    %255 = vector.broadcast %254 : vector<1x128xf32> to vector<8x128xf32>
    %256 = arith.addf %252, %255 : vector<8x128xf32>
    %257 = arith.addf %227, %256 : vector<8x128xf32>
    %c1_114 = arith.constant 1 : index
    %c0_115 = arith.constant 0 : index
    %c0_116 = arith.constant 0 : index
    %258 = vector.load %arg14[%c1_114, %c0_115, %c0_116] : memref<2x1x128xf32, #tpu.memory_space<vmem>>, vector<1x1x128xf32>
    %259 = vector.shape_cast %258 : vector<1x1x128xf32> to vector<1x128xf32>
    %c1_117 = arith.constant 1 : index
    %c0_118 = arith.constant 0 : index
    %c0_119 = arith.constant 0 : index
    %260 = vector.load %arg15[%c1_117, %c0_118, %c0_119] : memref<2x1x128xf32, #tpu.memory_space<vmem>>, vector<1x1x128xf32>
    %261 = vector.shape_cast %260 : vector<1x1x128xf32> to vector<1x128xf32>
    %cst_120 = arith.constant dense<0.000000e+00> : vector<8xf32>
    %262 = vector.multi_reduction <add>, %257, %cst_120 [1] : vector<8x128xf32> to vector<8xf32>
    %263 = vector.shape_cast %262 : vector<8xf32> to vector<8x1xf32>
    %cst_121 = arith.constant 1.280000e+02 : f32
    %264 = vector.broadcast %cst_121 : f32 to vector<8x1xf32>
    %265 = arith.divf %263, %264 : vector<8x1xf32>
    %266 = vector.broadcast %265 : vector<8x1xf32> to vector<8x128xf32>
    %267 = arith.subf %257, %266 : vector<8x128xf32>
    %268 = arith.mulf %267, %267 : vector<8x128xf32>
    %cst_122 = arith.constant dense<0.000000e+00> : vector<8xf32>
    %269 = vector.multi_reduction <add>, %268, %cst_122 [1] : vector<8x128xf32> to vector<8xf32>
    %270 = vector.shape_cast %269 : vector<8xf32> to vector<8x1xf32>
    %cst_123 = arith.constant 1.280000e+02 : f32
    %271 = vector.broadcast %cst_123 : f32 to vector<8x1xf32>
    %272 = arith.divf %270, %271 : vector<8x1xf32>
    %cst_124 = arith.constant 9.99999996E-13 : f32
    %273 = vector.broadcast %cst_124 : f32 to vector<8x1xf32>
    %274 = arith.addf %272, %273 : vector<8x1xf32>
    %275 = math.rsqrt %274 : vector<8x1xf32>
    %276 = vector.broadcast %275 : vector<8x1xf32> to vector<8x128xf32>
    %277 = arith.mulf %267, %276 : vector<8x128xf32>
    %278 = vector.broadcast %259 : vector<1x128xf32> to vector<8x128xf32>
    %279 = arith.mulf %277, %278 : vector<8x128xf32>
    %280 = vector.broadcast %261 : vector<1x128xf32> to vector<8x128xf32>
    %281 = arith.addf %279, %280 : vector<8x128xf32>
    %282 = arith.truncf %281 : vector<8x128xf32> to vector<8x128xbf16>
    %c0_125 = arith.constant 0 : index
    %c0_126 = arith.constant 0 : index
    %283 = vector.load %arg16[%c0_125, %c0_126] : memref<128x128xbf16, #tpu.memory_space<vmem>>, vector<128x128xbf16>
    %cst_127 = arith.constant dense<0.000000e+00> : vector<8x128xf32>
    %284 = tpu.matmul %282, %283, %cst_127 {dimension_numbers = #tpu.dot_dimension_numbers<[1], [0], [0], [1], [0, 0, 1, 1], [], []>} : vector<8x128xbf16>, vector<128x128xbf16>, vector<8x128xf32> -> vector<8x128xf32>
    %c0_128 = arith.constant 0 : index
    %c0_129 = arith.constant 0 : index
    %285 = vector.load %arg17[%c0_128, %c0_129] : memref<1x128xf32, #tpu.memory_space<vmem>>, vector<1x128xf32>
    %286 = vector.broadcast %285 : vector<1x128xf32> to vector<8x128xf32>
    %287 = arith.addf %284, %286 : vector<8x128xf32>
    %c0_130 = arith.constant 0 : index
    %c0_131 = arith.constant 0 : index
    %c0_132 = arith.constant 0 : index
    %288 = vector.load %arg18[%c0_130, %c0_131, %c0_132] : memref<1x8x128xf32, #tpu.memory_space<vmem>>, vector<1x8x128xf32>
    %289 = vector.shape_cast %288 : vector<1x8x128xf32> to vector<8x128xf32>
    %290 = vector.shape_cast %287 : vector<8x128xf32> to vector<1x8x128xf32>
    tpu.vector_store %arg18[%c0_130, %c0_131, %c0_132], %290 {strides = array<i32>} : memref<1x8x128xf32, #tpu.memory_space<vmem>>, vector<1x8x128xf32>,
    return
  }
  func.func @transform_0(%arg0: i32) -> (i32, i32, i32) {
    %c0_i32 = arith.constant 0 : i32
    %c0_i32_0 = arith.constant 0 : i32
    %c0_i32_1 = arith.constant 0 : i32
    return %arg0, %c0_i32, %c0_i32_0 : i32, i32, i32
  }
  func.func @transform_1(%arg0: i32) -> (i32, i32) {
    %c0_i32 = arith.constant 0 : i32
    %c0_i32_0 = arith.constant 0 : i32
    %c0_i32_1 = arith.constant 0 : i32
    return %c0_i32, %c0_i32_0 : i32, i32
  }
  func.func @transform_2(%arg0: i32) -> (i32, i32) {
    %c0_i32 = arith.constant 0 : i32
    %c0_i32_0 = arith.constant 0 : i32
    %c0_i32_1 = arith.constant 0 : i32
    return %c0_i32, %c0_i32_0 : i32, i32
  }
  func.func @transform_3(%arg0: i32) -> (i32, i32, i32) {
    %c0_i32 = arith.constant 0 : i32
    %c0_i32_0 = arith.constant 0 : i32
    %c0_i32_1 = arith.constant 0 : i32
    %c0_i32_2 = arith.constant 0 : i32
    return %c0_i32, %c0_i32_0, %c0_i32_1 : i32, i32, i32
  }
  func.func @transform_4(%arg0: i32) -> (i32, i32, i32) {
    %c0_i32 = arith.constant 0 : i32
    %c0_i32_0 = arith.constant 0 : i32
    %c0_i32_1 = arith.constant 0 : i32
    %c0_i32_2 = arith.constant 0 : i32
    return %c0_i32, %c0_i32_0, %c0_i32_1 : i32, i32, i32
  }
  func.func @transform_5(%arg0: i32) -> (i32, i32, i32) {
    %c0_i32 = arith.constant 0 : i32
    %c0_i32_0 = arith.constant 0 : i32
    %c0_i32_1 = arith.constant 0 : i32
    %c0_i32_2 = arith.constant 0 : i32
    return %c0_i32, %c0_i32_0, %c0_i32_1 : i32, i32, i32
  }
  func.func @transform_6(%arg0: i32) -> (i32, i32, i32) {
    %c0_i32 = arith.constant 0 : i32
    %c0_i32_0 = arith.constant 0 : i32
    %c0_i32_1 = arith.constant 0 : i32
    %c0_i32_2 = arith.constant 0 : i32
    return %c0_i32, %c0_i32_0, %c0_i32_1 : i32, i32, i32
  }
  func.func @transform_7(%arg0: i32) -> (i32, i32, i32) {
    %c0_i32 = arith.constant 0 : i32
    %c0_i32_0 = arith.constant 0 : i32
    %c0_i32_1 = arith.constant 0 : i32
    %c0_i32_2 = arith.constant 0 : i32
    return %c0_i32, %c0_i32_0, %c0_i32_1 : i32, i32, i32
  }
  func.func @transform_8(%arg0: i32) -> (i32, i32, i32) {
    %c0_i32 = arith.constant 0 : i32
    %c0_i32_0 = arith.constant 0 : i32
    %c0_i32_1 = arith.constant 0 : i32
    %c0_i32_2 = arith.constant 0 : i32
    return %c0_i32, %c0_i32_0, %c0_i32_1 : i32, i32, i32
  }
  func.func @transform_9(%arg0: i32) -> (i32, i32, i32) {
    %c0_i32 = arith.constant 0 : i32
    %c0_i32_0 = arith.constant 0 : i32
    %c0_i32_1 = arith.constant 0 : i32
    %c0_i32_2 = arith.constant 0 : i32
    return %c0_i32, %c0_i32_0, %c0_i32_1 : i32, i32, i32
  }
  func.func @transform_10(%arg0: i32) -> (i32, i32, i32) {
    %c0_i32 = arith.constant 0 : i32
    %c0_i32_0 = arith.constant 0 : i32
    %c0_i32_1 = arith.constant 0 : i32
    %c0_i32_2 = arith.constant 0 : i32
    return %c0_i32, %c0_i32_0, %c0_i32_1 : i32, i32, i32
  }
  func.func @transform_11(%arg0: i32) -> (i32, i32, i32) {
    %c0_i32 = arith.constant 0 : i32
    %c0_i32_0 = arith.constant 0 : i32
    %c0_i32_1 = arith.constant 0 : i32
    %c0_i32_2 = arith.constant 0 : i32
    return %c0_i32, %c0_i32_0, %c0_i32_1 : i32, i32, i32
  }
  func.func @transform_12(%arg0: i32) -> (i32, i32, i32) {
    %c0_i32 = arith.constant 0 : i32
    %c0_i32_0 = arith.constant 0 : i32
    %c0_i32_1 = arith.constant 0 : i32
    %c0_i32_2 = arith.constant 0 : i32
    return %c0_i32, %c0_i32_0, %c0_i32_1 : i32, i32, i32
  }
  func.func @transform_13(%arg0: i32) -> (i32, i32, i32) {
    %c0_i32 = arith.constant 0 : i32
    %c0_i32_0 = arith.constant 0 : i32
    %c0_i32_1 = arith.constant 0 : i32
    %c0_i32_2 = arith.constant 0 : i32
    return %c0_i32, %c0_i32_0, %c0_i32_1 : i32, i32, i32
  }
  func.func @transform_14(%arg0: i32) -> (i32, i32, i32) {
    %c0_i32 = arith.constant 0 : i32
    %c0_i32_0 = arith.constant 0 : i32
    %c0_i32_1 = arith.constant 0 : i32
    %c0_i32_2 = arith.constant 0 : i32
    return %c0_i32, %c0_i32_0, %c0_i32_1 : i32, i32, i32
  }
  func.func @transform_15(%arg0: i32) -> (i32, i32) {
    %c0_i32 = arith.constant 0 : i32
    %c0_i32_0 = arith.constant 0 : i32
    %c0_i32_1 = arith.constant 0 : i32
    return %c0_i32, %c0_i32_0 : i32, i32
  }
  func.func @transform_16(%arg0: i32) -> (i32, i32) {
    %c0_i32 = arith.constant 0 : i32
    %c0_i32_0 = arith.constant 0 : i32
    %c0_i32_1 = arith.constant 0 : i32
    return %c0_i32, %c0_i32_0 : i32, i32
  }
  func.func @transform_17(%arg0: i32) -> (i32, i32, i32) {
    %c0_i32 = arith.constant 0 : i32
    %c0_i32_0 = arith.constant 0 : i32
    %c0_i32_1 = arith.constant 0 : i32
    return %arg0, %c0_i32, %c0_i32_0 : i32, i32, i32
  }
}

</mosaic_0001>

<bundles_post_ra>
// kernel: linear_bert_forward.1
= control target key start
LH: loop header
LB: loop body
LE: loop exit
PB: predicated region body
PF: predicated region fallthrough
CT: control target
= control target key end

     0   :  { %s4189_s0 = inlined_call_operand.vmem [shape: f32[2,8,128], index: 0, kind: input, shape index: {}]   ;;  %s4190_s1 = inlined_call_operand.vmem [shape: f32[1,128], index: 1, kind: input, shape index: {}]   ;;  %s4191_s2 = inlined_call_operand.vmem [shape: f32[1,128], index: 2, kind: input, shape index: {}]   ;;  %s4192_s3 = inlined_call_operand.hbm [shape: bf16[2,128,384], index: 3, kind: input, shape index: {}]   ;;  %s4193_s4 = inlined_call_operand.vmem [shape: f32[2,1,384], index: 4, kind: input, shape index: {}]   ;;  %s4194_s5 = inlined_call_operand.hbm [shape: bf16[2,128,128], index: 5, kind: input, shape index: {}]   ;;  %s4195_s6 = inlined_call_operand.vmem [shape: f32[2,1,128], index: 6, kind: input, shape index: {}]   ;;  %s4196_s7 = inlined_call_operand.vmem [shape: f32[2,1,128], index: 7, kind: input, shape index: {}]   ;;  %s4197_s8 = inlined_call_operand.vmem [shape: f32[2,1,128], index: 8, kind: input, shape index: {}]   ;;  %s4198_s9 = inlined_call_operand.vmem [shape: bf16[2,128,256], index: 9, kind: input, shape index: {}]   ;;  %s4199_s10 = inlined_call_operand.vmem [shape: f32[2,1,256], index: 10, kind: input, shape index: {}]   ;;  %s4200_s11 = inlined_call_operand.hbm [shape: bf16[2,256,128], index: 11, kind: input, shape index: {}]   ;;  %s4201_s12 = inlined_call_operand.vmem [shape: f32[2,1,128], index: 12, kind: input, shape index: {}]   ;;  %s4202_s13 = inlined_call_operand.vmem [shape: f32[2,1,128], index: 13, kind: input, shape index: {}]   ;;  %s4203_s14 = inlined_call_operand.vmem [shape: f32[2,1,128], index: 14, kind: input, shape index: {}]   ;;  %s4204_s15 = inlined_call_operand.vmem [shape: bf16[128,128], index: 15, kind: input, shape index: {}]   ;;  %s4205_s16 = inlined_call_operand.vmem [shape: f32[1,128], index: 16, kind: input, shape index: {}]   ;;  %s4206_s17 = inlined_call_operand.vmem [shape: f32[2,8,128], index: 17, kind: output, shape index: {}]  }
   0x1   :  { %4212 = sst [smem:[#allocation10_spill]] %s4189_s0 }
   0x2   :  { %4213 = sst [smem:[#allocation11_spill]] %s4190_s1 }
   0x3   :  { %4214 = sst [smem:[#allocation12_spill]] %s4204_s15 }
   0x4   :  { %4215 = sst [smem:[#allocation13_spill]] %s4205_s16 }
   0x5   :  { %4216 = sst [smem:[#allocation14_spill]] %s4206_s17 }
   0x6   :  { %22 = vsyncpa [#allocation3], 0 }
   0x7   :  { %23 = vsyncpa [#allocation5], 0  ;;  %s3725_s24 = smov 0  }
   0x8 LB: > { %4217 = sst [smem:[#allocation9_spill]] %s3622_s24  ;;  %s3624_s25 = smov [#allocation4]   ;;  %s3622_s24 = sphi %s3725_s24, %s29_s24  }
   0x9   : > { %s456_s26 = sshll.u32 %s3624_s25, 4  ;;  %s3731_s27 = sadd.s32 4294967295, %s3622_s24   ;;  %s3740_s26 = int_to_ptr.vmem [resolvable:$true] %s456_s26 }
   0xa   : > { %p2826_p0 = scmp.ge.s32.totalorder %s3622_s24, 1  ;;  %p422_p1 = scmp.lt.s32.totalorder %s3622_s24, 3 }
   0xb   : > { %p4210_p2 = scmp.eq.s32.totalorder %s3731_s27, 0  ;;  %s3625_s29 = smov [#allocation2]  }
   0xc   : > { %p3736_p3 = pnand %p2826_p0, %p422_p1  ;;  %s440_s0 = sshll.u32 %s3625_s29, 4  ;;  %s3744_s0 = int_to_ptr.vmem [resolvable:$true] %s440_s0 }
   0xd   : > { %s3626_s18 = smov [#allocation6]   ;;  %s3524_s21 = scalar_lea.hbm %s4194_s5, 2048 }
   0xe   : > { %s4218_s28 = scalar_select %p3736_p3, 1, 0 }
   0xf   : > { %p3287_p4 = pneg %p3736_p3  ;;  %s3752_s19 = sshll.u32 %s3626_s18, 4  ;;  %s485_s19 = int_to_ptr.vmem [resolvable:$true] %s3752_s19 }
  0x10   : > { %p3525_p6 = scmp.ne.s32.totalorder %s4194_s5, %s3524_s21  ;;  %p3531_p10 = scmp.lt.u32.totalorder %s3524_s21, %s4194_s5 }
  0x11   : > { %p3748_p5 = pnand %p4210_p2, %p3287_p4 }
  0x13   : > { %p3762_p7 = pneg %p3748_p5 }
  0x15   : > { %p3527_p8 = pnand %p3762_p7, %p3525_p6 }
  0x17   : > { %p3528_p9 = pneg %p3527_p8 }
  0x19   : > { %p3533_p11 = pnand %p3531_p10, %p3528_p9 }
  0x1b   : > { %3536 = shalt.err (!%p3533_p11)
}
  0x1c   : > { %s3537_s1 = scalar_lea.vmem %s3740_s26, 2048  ;;  %p3545_p1 = scmp.lt.s32.totalorder %s3740_s26, %s3740_s26 }
  0x1d   : > { %p3538_p12 = scmp.ne.s32.totalorder %s3740_s26, %s3537_s1  ;;  %p3546_p4 = scmp.lt.s32.totalorder %s3537_s1, %s3537_s1 }
  0x1f   : > { %p3540_p13 = pnand %p3538_p12, %p3762_p7  ;;  %p3547_p6 = por %p3546_p4, %p3545_p1 }
  0x21   : > { %p3541_p0 = pneg %p3540_p13 }
  0x23   : > { %p3548_p8 = pnand %p3547_p6, %p3541_p0 }
  0x25   : > { %3551 = shalt.err (!%p3548_p8)
}
  0x26   : > { %s4209_s20 = smov 64   ;;  %s3628_s21 = smov 4  }
  0x27   : > { %3293 = dma.hbm_to_vmem [thread:$0]  (!%p3748_p5), %s4194_s5, 2048, %s3740_s26, [#allocation5], %s4209_s20, %s4209_s20, %s3628_s21  }
  0x28   : > { %s3552_s1 = scalar_lea.hbm %s4192_s3, 6144 }
  0x29   : > { %p3553_p9 = scmp.ne.s32.totalorder %s4192_s3, %s3552_s1  ;;  %p3559_p12 = scmp.lt.u32.totalorder %s3552_s1, %s4192_s3 }
  0x2b   : > { %p3555_p10 = pnand %p3553_p9, %p3762_p7 }
  0x2d   : > { %p3556_p11 = pneg %p3555_p10 }
  0x2f   : > { %p3561_p13 = pnand %p3559_p12, %p3556_p11 }
  0x31   : > { %3564 = shalt.err (!%p3561_p13)
}
  0x32   : > { %s3565_s26 = scalar_lea.vmem %s3744_s0, 6144  ;;  %p3573_p6 = scmp.lt.s32.totalorder %s3744_s0, %s3744_s0 }
  0x33   : > { %p3566_p0 = scmp.ne.s32.totalorder %s3744_s0, %s3565_s26  ;;  %p3574_p8 = scmp.lt.s32.totalorder %s3565_s26, %s3565_s26 }
  0x35   : > { %p3568_p1 = pnand %p3566_p0, %p3762_p7  ;;  %p3575_p9 = por %p3574_p8, %p3573_p6 }
  0x37   : > { %p3569_p4 = pneg %p3568_p1 }
  0x39   : > { %p3576_p10 = pnand %p3575_p9, %p3569_p4 }
  0x3b   : > { %3579 = shalt.err (!%p3576_p10)
}
  0x3c   : > { %s3629_s17 = smov 192   ;;  %s3630_s15 = smov 12  }
  0x3d   : > { %3290 = dma.hbm_to_vmem [thread:$0]  (!%p3748_p5), %s4192_s3, 6144, %s3744_s0, [#allocation3], %s3629_s17, %s3629_s17, %s3630_s15  }
  0x3e   : > { %s3580_s29 = scalar_lea.hbm %s4200_s11, 4096 }
  0x3f   : > { %p3581_p11 = scmp.ne.s32.totalorder %s4200_s11, %s3580_s29  ;;  %p3587_p0 = scmp.lt.u32.totalorder %s3580_s29, %s4200_s11 }
  0x41   : > { %p3583_p12 = pnand %p3581_p11, %p3762_p7 }
  0x43   : > { %p3584_p13 = pneg %p3583_p12 }
  0x45   : > { %p3589_p1 = pnand %p3587_p0, %p3584_p13 }
  0x47   : > { %3592 = shalt.err (!%p3589_p1)
}
  0x48   : > { %s3593_s16 = scalar_lea.vmem %s485_s19, 4096  ;;  %p3601_p9 = scmp.lt.s32.totalorder %s485_s19, %s485_s19 }
  0x49   : > { %p3594_p4 = scmp.ne.s32.totalorder %s485_s19, %s3593_s16  ;;  %p3602_p10 = scmp.lt.s32.totalorder %s3593_s16, %s3593_s16 }
  0x4b   : > { %p3596_p6 = pnand %p3594_p4, %p3762_p7  ;;  %p3603_p2 = por %p3602_p10, %p3601_p9 }
  0x4d   : > { %p3597_p8 = pneg %p3596_p6 }
  0x4f   : > { %p3604_p3 = pnand %p3603_p2, %p3597_p8 }
  0x51   : > { %3607 = shalt.err (!%p3604_p3)
}
  0x52   : > { %s4221_s0 = smov 64   ;;  %p4222_p11 = scmp.ne.s32.totalorder %s4218_s28, 0 }
  0x53   : > { %3296 = dma.hbm_to_vmem [thread:$0]  (!%p3748_p5), %s4200_s11, 4096, %s485_s19, [#allocation5], %s4221_s0, %s4221_s0, %s3628_s21  }
  0x54   : > { %522 = sbr.rel (%p4222_p11) target bundleno = 5639 (0x1607), region = 88  ;;  %p4223_p7 = scmp.eq.s32.totalorder (!%p4222_p11), %s3731_s27, 0 }
  0x5b   : > { %3613 = dma.done.wait (%p4223_p7), [#allocation3], 6144   ;;  %p4224_p12 = pmov %p4223_p7 }
  0x5c   : > { %p4225_p2 = pmov %p4223_p7 }
  0x5d   : > { %3615 = vsyncadd (%p4224_p12), [#allocation3], 4294961152 }
  0x5e   : > { %3617 = dma.done.wait (%p4225_p2), [#allocation5], 6144   ;;  %p4226_p3 = pmov %p4225_p2 }
  0x5f   : > { %p580_p13 = scmp.lt.s32.totalorder %s3731_s27, 1  ;;  %s4227_s25 = sld [smem:[#allocation10_spill]]  ;;  %v3322_v1 = vld [vmem:[#allocation2 + $0x4] ss:$12 sps:$4 sm:$0xff]   ;;  %v3324_v2 = vld [vmem:[#allocation2] ss:$12 sps:$4 sm:$0xff]   ;;  %v653_v41 = vlaneseq }
  0x60   : > { %3619 = vsyncadd (%p4226_p3), [#allocation5], 4294961152  ;;  %v3631_v3 = vmov 0.0   ;;  %v3325_v4 = vld [vmem:[#allocation2 + $0x8] ss:$12 sps:$4 sm:$0xff]   ;;  %796 = vmatprep.subr.bf16.mxu0 %v3322_v1  ;;  %v3632_v25 = vmov 0  }
  0x61   : > { %s4234_s27 = smov (!%p580_p13, %s3731_s27), 1  ;;  %3127 = vmatprep.subr.bf16.mxu1 %v3631_v3  ;;  %v3326_v5 = vld [vmem:[#allocation2 + $0x1c] ss:$12 sps:$4 sm:$0xff]   ;;  %v3328_v6 = vld [vmem:[#allocation2 + $0x18] ss:$12 sps:$4 sm:$0xff]   ;;  %797 = vmatpush1.bf16.msra.mxu0 %v3324_v2  ;;  %vm3633_vm0 = vmmov 0  }
  0x62   : > { %s2835_s28 = sshll.u32 %s4234_s27, 3  ;;  %v3329_v7 = vld [vmem:[#allocation2 + $0x20] ss:$12 sps:$4 sm:$0xff]   ;;  %3128 = vmatpush3.bf16.msra.mxu1 %v3325_v4  ;;  %798 = vmatprep.subr.bf16.mxu0 %v3326_v5  ;;  %v3332_v13 = vld [vmem:[#allocation2 + $0x30] ss:$12 sps:$4 sm:$0xff]   ;;  %s4228_s22 = sld [smem:[#allocation11_spill]] }
  0x63   : > { %v3330_v8 = vld [vmem:[#allocation2 + $0x34] ss:$12 sps:$4 sm:$0xff]   ;;  %3129 = vmatprep.subr.bf16.mxu1 %v3631_v3  ;;  %v3333_v14 = vld [vmem:[#allocation2 + $0x38] ss:$12 sps:$4 sm:$0xff]   ;;  %v3337_v17 = vld [vmem:[#allocation2 + $0x50] ss:$12 sps:$4 sm:$0xff]   ;;  %828 = vmatprep.mubr.bf16.mxu0 %v3632_v25 }
  0x64   : > { %v3334_v15 = vld [vmem:[#allocation2 + $0x4c] ss:$12 sps:$4 sm:$0xff]   ;;  %v3336_v16 = vld [vmem:[#allocation2 + $0x48] ss:$12 sps:$4 sm:$0xff]   ;;  %v3338_v18 = vld [vmem:[#allocation2 + $0x64] ss:$12 sps:$4 sm:$0xff]   ;;  %3143 = vmatprep.mubr.msk.bf16.mxu1 %vm3633_vm0, %v3631_v3 }
  0x65   : > { %s583_s21 = scalar_lea.vmem %s4227_s25, %s2835_s28  ;;  %799 = vmatpush1.bf16.msra.mxu0 %v3328_v6  ;;  %v3340_v19 = vld [vmem:[#allocation2 + $0x60] ss:$12 sps:$4 sm:$0xff]   ;;  %v3341_v20 = vld [vmem:[#allocation2 + $0x68] ss:$12 sps:$4 sm:$0xff]   ;;  %v3344_v22 = vld [vmem:[#allocation2 + $0x78] ss:$12 sps:$4 sm:$0xff]  }
  0x66   : > { %v589_v0 = vld [vmem:[%s583_s21] sm:$0xff]  ;;  %3130 = vmatpush3.bf16.msra.mxu1 %v3329_v7  ;;  %800 = vmatprep.subr.bf16.mxu0 %v3330_v8  ;;  %v3342_v21 = vld [vmem:[#allocation2 + $0x7c] ss:$12 sps:$4 sm:$0xff]   ;;  %v3350_v28 = vld [vmem:[#allocation2 + $0xac] ss:$12 sps:$4 sm:$0xff]   ;;  %v3878_v42 = vshrl.u32 %v653_v41, 7 }
  0x67   : > { %592 = vadd.xlane.f32.xlu0 %v589_v0  ;;  %3131 = vmatprep.subr.bf16.mxu1 %v3631_v3  ;;  %v3345_v23 = vld [vmem:[#allocation2 + $0x80] ss:$12 sps:$4 sm:$0xff]   ;;  %v3348_v26 = vld [vmem:[#allocation2 + $0x90] ss:$12 sps:$4 sm:$0xff]   ;;  %v3349_v27 = vld [vmem:[#allocation2 + $0x98] ss:$12 sps:$4 sm:$0xff]  }
  0x68   : > { %v3346_v24 = vld [vmem:[#allocation2 + $0x94] ss:$12 sps:$4 sm:$0xff]   ;;  %v3353_v30 = vld [vmem:[#allocation2 + $0xb0] ss:$12 sps:$4 sm:$0xff]   ;;  %v3881_v43 = vsub.s32 1, %v3878_v42  ;;  %v3887_v45 = vsub.s32 0, %v3878_v42 }
  0x69   : > { %801 = vmatpush1.bf16.msra.mxu0 %v3332_v13  ;;  %v3352_v29 = vld [vmem:[#allocation2 + $0xa8] ss:$12 sps:$4 sm:$0xff]   ;;  %v2837_v35 = vld [vmem:[%s4228_s22] ss:$0 sm:$0xff]  ;;  %v663_v46 = vsub.s32 2, %v3878_v42  ;;  %vm889_vm1 = vcmask 523264  }
  0x6a   : > { %3132 = vmatpush3.bf16.msra.mxu1 %v3333_v14  ;;  %802 = vmatprep.subr.bf16.mxu0 %v3334_v15  ;;  %v2838_v37 = vld [vmem:[%s4191_s2] ss:$0 sm:$0xff]  ;;  %s3634_s26 = smov 64   ;;  %vm1010_vm2 = vcmask 1043456   ;;  %vm982_vm3 = vcmask 64512   ;;  %v3357_v41 = vld [vmem:[#allocation4 + $0x18] sm:$0xff]  }
  0x6b   : > { %3133 = vmatprep.subr.bf16.mxu1 %v3631_v3  ;;  %v651_v44 = vld [vmem:[%s4193_s4] sm:$0x7]  ;;  %s4229_s1 = sld [smem:[#allocation12_spill]]  ;;  %s4231_s21 = sld [smem:[#allocation14_spill]] }
  0x6c   : > { %v660_v47 = vrot.slane %v651_v44, %v3881_v43  ;;  %v656_v48 = vrot.slane %v651_v44, %v3887_v45  ;;  %v664_v53 = vrot.slane %v651_v44, %v663_v46  ;;  %v3358_v44 = vld [vmem:[#allocation4 + $0x20] sm:$0xff]  }
  0x6d   : > { %803 = vmatpush1.bf16.msra.mxu0 %v3336_v16 }
  0x6e   : > { %3134 = vmatpush3.bf16.msra.mxu1 %v3337_v17  ;;  %804 = vmatprep.subr.bf16.mxu0 %v3338_v18 }
  0x6f   : > { %3135 = vmatprep.subr.bf16.mxu1 %v3631_v3 }
  0x71   : > { %805 = vmatpush1.bf16.msra.mxu0 %v3340_v19  ;;  %s587_s15 = scalar_lea.vmem %s4231_s21, %s2835_s28 }
  0x72   : > { %3136 = vmatpush3.bf16.msra.mxu1 %v3341_v20  ;;  %806 = vmatprep.subr.bf16.mxu0 %v3342_v21 }
  0x73   : > { %3137 = vmatprep.subr.bf16.mxu1 %v3631_v3 }
  0x75   : > { %807 = vmatpush1.bf16.msra.mxu0 %v3344_v22 }
  0x76   : > { %3138 = vmatpush3.bf16.msra.mxu1 %v3345_v23  ;;  %808 = vmatprep.subr.bf16.mxu0 %v3346_v24 }
  0x77   : > { %3139 = vmatprep.subr.bf16.mxu1 %v3631_v3 }
  0x79   : > { %809 = vmatpush1.bf16.msra.mxu0 %v3348_v26 }
  0x7a   : > { %3140 = vmatpush3.bf16.msra.mxu1 %v3349_v27  ;;  %810 = vmatprep.subr.bf16.mxu0 %v3350_v28 }
  0x7b   : > { %3141 = vmatprep.subr.bf16.mxu1 %v3631_v3 }
  0x7d   : > { %811 = vmatpush1.bf16.msra.mxu0 %v3352_v29 }
  0x7e   : > { %3142 = vmatpush3.bf16.msra.mxu1 %v3353_v30  ;;  %3147 = vmatprep.subr.bf16.mxu0 %v3631_v3 }
  0x7f   : > { %3153 = vmatprep.subr.bf16.mxu1 %v3631_v3 }
  0xf4   : > { %v593_v9 = vpop.xlane.xlu0 %592 }
  0xf5   : > { %v595_v10 = vmul.f32 0.0078125, %v593_v9 }
  0xf7   : > { %v596_v11 = vsub.f32 %v589_v0, %v595_v10 }
  0xf9   : > { %v597_v12 = vmul.f32 %v596_v11, %v596_v11 }
  0xfb   : > { %598 = vadd.xlane.f32.xlu0 %v597_v12 }
 0x188   : > { %v599_v31 = vpop.xlane.xlu0 %598 }
 0x189   : > { %v600_v32 = vmul.f32 0.0078125, %v599_v31 }
 0x18b   : > { %v601_v33 = vadd.f32 1e-12, %v600_v32 }
 0x18d   : > { %3490 = vrsqrt.f32 %v601_v33 }
 0x197   : > { %v3491_v34 = vpop.eup %3490 }
 0x198   : > { %v603_v36 = vmul.f32 %v3491_v34, %v596_v11 }
 0x19a   : > { %v610_v38 = vmul.f32 %v2837_v35, %v603_v36 }
 0x19c   : > { %v3870_v39 = vadd.f32 %v2838_v37, %v610_v38  ;;  %v3354_v37 = vld [vmem:[#allocation4] sm:$0xff]   ;;  %v3355_v38 = vld [vmem:[#allocation4 + $0x8] sm:$0xff]  }
 0x19e   : > { %v618_v40 = vpack.c.bf16 %v3870_v39, %v3870_v39 }
 0x1a0   : > { %829 = vmatmul.mubr.bf16.vlgmr.msra.gmra.mrb[0].mxu0 %v618_v40  ;;  %3144 = vmatmul.mubr.bf16.vlgmr.msra.gmra.mrb[0].mxu1 %v618_v40  ;;  %v3356_v40 = vld [vmem:[#allocation4 + $0x10] sm:$0xff]  }
 0x1a1   : > { %3149 = vmatprep.mubr.msk.bf16.mxu0 %vm3633_vm0, %v3631_v3  ;;  %3155 = vmatprep.mubr.msk.bf16.mxu1 %vm3633_vm0, %v3631_v3 }
 0x273   : > { %v830_v49 = vpop.f32.mrb[0].mxu0  ;;  %v871_v50 = vpop.f32.mrb[0].mxu1 }
 0x274   : > { %v832_v51 = vpop.f32.mrb[1].mxu0  ;;  %v3145_v52 = vpop.f32.mrb[1].mxu1  ;;  %v831_v59 = vadd.f32 %v830_v49, %v656_v48  ;;  %v872_v61 = vadd.f32 %v871_v50, %v664_v53  ;;  %v3360_v48 = vld [vmem:[#allocation4 + $0x30] sm:$0xff]   ;;  %v3361_v49 = vld [vmem:[#allocation4 + $0x38] sm:$0xff]  }
 0x275   : > { %v833_v54 = vadd.f32 %v832_v51, %v660_v47  ;;  %v834_v55 = vpop.f32.mrb[2].mxu0  ;;  %v874_v56 = vpop.f32.mrb[2].mxu1  ;;  %v3359_v47 = vld [vmem:[#allocation4 + $0x28] sm:$0xff]  }
 0x276   : > { %v835_v57 = vpop.f32.mrb[3].mxu0  ;;  %v3146_v58 = vpop.f32.mrb[3].mxu1  ;;  %v877_v63 = vpack.c.bf16 %v831_v59, %v831_v59  ;;  %v879_v0 = vpack.c.bf16 %v872_v61, %v872_v61  ;;  %v2867_v61 = vld [vmem:[%s4195_s6] ss:$0 sm:$0xff] }
 0x277   : > { %v878_v60 = vpack.c.bf16 %v833_v54, %v833_v54 }
 0x278   : > { %v1012_v1 = vsel %vm1010_vm2, %v879_v0, 0 }
 0x279   : > { %v894_v62 = vsel %vm889_vm1, %v878_v60, 0  ;;  %884 = vrot.lane.b32.xlu1 %v878_v60, %s3634_s26 }
 0x27a   : > { %3148 = vmatpush3.bf16.xpose.msra.mxu0 %v894_v62 }
 0x27b   : > { %3159 = vmatprep.subr.bf16.mxu0 %v3631_v3 }
 0x27d   : > { %881 = vrot.lane.b32.xlu1 %v877_v63, %s3634_s26 }
 0x281   : > { %3150 = vmatmul.mubr.msk.bf16.vlgmr.msra.gmra.mrb[4].mxu0 %vm889_vm1, %v877_v63 }
 0x282   : > { %3160 = vmatpush3.bf16.msra.mxu0 %v1012_v1  ;;  %3161 = vmatprep.mubr.msk.bf16.mxu0 %vm3633_vm0, %v3631_v3 }
 0x283   : > { %3171 = vmatprep.subr.bf16.mxu0 %v3631_v3 }
 0x2eb   : > { %v885_v2 = vpop.permute.xlu1 %884 }
 0x2ec   : > { %v940_v4 = vsel %vm889_vm1, %v885_v2, 0 }
 0x2ed   : > { %3154 = vmatpush3.bf16.xpose.msra.mxu1 %v940_v4 }
 0x2ee   : > { %3165 = vmatprep.subr.bf16.mxu1 %v3631_v3 }
 0x2ef   : > { %v882_v5 = vpop.permute.xlu1 %881 }
 0x2f4   : > { %3156 = vmatmul.mubr.msk.bf16.vlgmr.msra.gmra.mrb[4].mxu1 %vm889_vm1, %v882_v5  ;;  %v3362_v5 = vld [vmem:[%s4198_s9] ss:$8 sps:$4 sm:$0xff]  }
 0x2f5   : > { %3167 = vmatprep.mubr.msk.bf16.mxu1 %vm3633_vm0, %v3631_v3 }
 0x354   : > { %v930_v6 = vpop.f32.mrb[4].mxu0 }
 0x355   : > { %v3151_v7 = vpop.f32.mrb[5].mxu0  ;;  %v983_v8 = vsel %vm982_vm3, %v930_v6, -inf }
 0x356   : > { %984 = vmax.xlane.f32.xlu1 %v983_v8  ;;  %v933_v9 = vpop.f32.mrb[6].mxu0  ;;  %v3367_v7 = vld [vmem:[%s4198_s9 + $0x14] ss:$8 sps:$4 sm:$0xff]   ;;  %v3365_v8 = vld [vmem:[%s4198_s9 + $0x10] ss:$8 sps:$4 sm:$0xff]  }
 0x357   : > { %v3152_v10 = vpop.f32.mrb[7].mxu0  ;;  %v3368_v9 = vld [vmem:[%s4198_s9 + $0x20] ss:$8 sps:$4 sm:$0xff]  }
 0x3c7   : > { %v976_v11 = vpop.f32.mrb[4].mxu1 }
 0x3c8   : > { %v3157_v12 = vpop.f32.mrb[5].mxu1  ;;  %v986_v13 = vsel %vm982_vm3, %v976_v11, -inf }
 0x3c9   : > { %987 = vmax.xlane.f32.xlu0 %v986_v13  ;;  %v979_v14 = vpop.f32.mrb[6].mxu1 }
 0x3ca   : > { %v3158_v15 = vpop.f32.mrb[7].mxu1  ;;  %v3373_v14 = vld [vmem:[%s4198_s9 + $0x34] ss:$8 sps:$4 sm:$0xff]  }
 0x3cb   : > { %v3371_v15 = vld [vmem:[%s4198_s9 + $0x30] ss:$8 sps:$4 sm:$0xff]  }
 0x3e3   : > { %v985_v21 = vpop.xlane.xlu1 %984 }
 0x3e4   : > { %v989_v22 = vsub.f32 %v930_v6, %v985_v21  ;;  %v3364_v6 = vld [vmem:[%s4198_s9 + $0x4] ss:$8 sps:$4 sm:$0xff]   ;;  %v3380_v21 = vld [vmem:[%s4198_s9 + $0x60] ss:$8 sps:$4 sm:$0xff]  }
 0x3e6   : > { %v991_v23 = vmul.f32 1.442695, %v989_v22  ;;  %v3385_v22 = vld [vmem:[%s4198_s9 + $0x74] ss:$8 sps:$4 sm:$0xff]  }
 0x456   : > { %v988_v16 = vpop.xlane.xlu0 %987 }
 0x457   : > { %v990_v17 = vsub.f32 %v976_v11, %v988_v16  ;;  %v3376_v16 = vld [vmem:[%s4198_s9 + $0x44] ss:$8 sps:$4 sm:$0xff]  }
 0x459   : > { %v993_v18 = vmul.f32 1.442695, %v990_v17  ;;  %v3374_v17 = vld [vmem:[%s4198_s9 + $0x40] ss:$8 sps:$4 sm:$0xff]  }
 0x45b   : > { %3492 = vpow2.f32 %v993_v18  ;;  %v3379_v18 = vld [vmem:[%s4198_s9 + $0x54] ss:$8 sps:$4 sm:$0xff]  }
 0x45c   : > { %3494 = vpow2.f32 %v991_v23  ;;  %v3383_v23 = vld [vmem:[%s4198_s9 + $0x70] ss:$8 sps:$4 sm:$0xff]  }
 0x465   : > { %v3493_v19 = vpop.eup %3492 }
 0x466   : > { %v998_v20 = vsel %vm982_vm3, %v3493_v19, 0.0  ;;  %v3495_v24 = vpop.eup %3494 }
 0x467   : > { %999 = vadd.xlane.f32.xlu0 %v998_v20  ;;  %v995_v26 = vsel %vm982_vm3, %v3495_v24, 0.0  ;;  %v3382_v20 = vld [vmem:[%s4198_s9 + $0x64] ss:$8 sps:$4 sm:$0xff]  }
 0x47d   : > { %887 = vrot.lane.b32.xlu0 %v879_v0, %s3634_s26 }
 0x49c   : > { %996 = vadd.xlane.f32.xlu0 %v995_v26 }
 0x4f4   : > { %v1000_v27 = vpop.xlane.xlu0 %999 }
 0x4f5   : > { %3496 = vrcp.f32 %v1000_v27 }
 0x4f8   : > { %v888_v28 = vpop.permute.xlu0 %887 }
 0x4f9   : > { %v1058_v29 = vsel %vm1010_vm2, %v888_v28, 0 }
 0x4fa   : > { %3166 = vmatpush3.bf16.msra.mxu1 %v1058_v29  ;;  %v2876_v29 = vld [vmem:[%s4196_s7] ss:$0 sm:$0xff] }
 0x4fb   : > { %1354 = vmatprep.subr.bf16.mxu1 %v3364_v6 }
 0x4ff   : > { %v3497_v30 = vpop.eup %3496 }
 0x500   : > { %v1004_v31 = vmul.f32 %v3497_v30, %v3493_v19  ;;  %v3377_v19 = vld [vmem:[%s4198_s9 + $0x50] ss:$8 sps:$4 sm:$0xff]  }
 0x502   : > { %v1006_v32 = vpack.c.bf16 %v1004_v31, %v1004_v31  ;;  %v2877_v31 = vld [vmem:[%s4197_s8] ss:$0 sm:$0xff] }
 0x504   : > { %3168 = vmatmul.mubr.msk.bf16.vlgmr.msra.gmra.mrb[8].mxu1 %vm982_vm3, %v1006_v32 }
 0x505   : > { %1386 = vmatprep.mubr.bf16.mxu1 %v3632_v25  ;;  %1355 = vmatpush1.bf16.msra.mxu1 %v3362_v5 }
 0x506   : > { %1356 = vmatprep.subr.bf16.mxu1 %v3367_v7 }
 0x509   : > { %1357 = vmatpush1.bf16.msra.mxu1 %v3365_v8 }
 0x529   : > { %v997_v33 = vpop.xlane.xlu0 %996 }
 0x52a   : > { %3498 = vrcp.f32 %v997_v33 }
 0x534   : > { %v3499_v34 = vpop.eup %3498 }
 0x535   : > { %v1003_v35 = vmul.f32 %v3499_v34, %v3495_v24 }
 0x537   : > { %v1005_v36 = vpack.c.bf16 %v1003_v35, %v1003_v35  ;;  %v3386_v35 = vld [vmem:[#allocation6 + $0x40] sm:$0xff]  }
 0x539   : > { %3162 = vmatmul.mubr.msk.bf16.vlgmr.msra.gmra.mrb[8].mxu0 %vm982_vm3, %v1005_v36  ;;  %v3387_v36 = vld [vmem:[#allocation6] sm:$0xff]  }
 0x53a   : > { %3187 = vmatprep.mubr.msk.bf16.mxu0 %vm3633_vm0, %v3631_v3  ;;  %3172 = vmatpush3.bf16.msra.mxu0 %v3354_v37  ;;  %v3388_v37 = vld [vmem:[#allocation6 + $0x48] sm:$0xff]  }
 0x53b   : > { %3173 = vmatprep.subr.bf16.mxu0 %v3631_v3 }
 0x53e   : > { %3174 = vmatpush3.bf16.msra.mxu0 %v3355_v38  ;;  %v3389_v38 = vld [vmem:[#allocation6 + $0x8] sm:$0xff]  }
 0x53f   : > { %3175 = vmatprep.subr.bf16.mxu0 %v3631_v3 }
 0x542   : > { %3176 = vmatpush3.bf16.msra.mxu0 %v3356_v40  ;;  %v3390_v40 = vld [vmem:[#allocation6 + $0x50] sm:$0xff]  }
 0x543   : > { %3177 = vmatprep.subr.bf16.mxu0 %v3631_v3 }
 0x546   : > { %3178 = vmatpush3.bf16.msra.mxu0 %v3357_v41  ;;  %v3391_v41 = vld [vmem:[#allocation6 + $0x10] sm:$0xff]  }
 0x547   : > { %3179 = vmatprep.subr.bf16.mxu0 %v3631_v3 }
 0x54a   : > { %3180 = vmatpush3.bf16.msra.mxu0 %v3358_v44  ;;  %v3392_v44 = vld [vmem:[#allocation6 + $0x58] sm:$0xff]  }
 0x54b   : > { %3181 = vmatprep.subr.bf16.mxu0 %v3631_v3 }
 0x54e   : > { %3182 = vmatpush3.bf16.msra.mxu0 %v3359_v47  ;;  %v3393_v47 = vld [vmem:[#allocation6 + $0x18] sm:$0xff]  }
 0x54f   : > { %3183 = vmatprep.subr.bf16.mxu0 %v3631_v3 }
 0x552   : > { %3184 = vmatpush3.bf16.msra.mxu0 %v3360_v48  ;;  %v3394_v48 = vld [vmem:[#allocation6 + $0x60] sm:$0xff]  }
 0x553   : > { %3185 = vmatprep.subr.bf16.mxu0 %v3631_v3 }
 0x556   : > { %3186 = vmatpush3.bf16.msra.mxu0 %v3361_v49  ;;  %v3395_v49 = vld [vmem:[#allocation6 + $0x20] sm:$0xff]  }
 0x557   : > { %3048 = vmatprep.subr.bf16.mxu0 %v3386_v35  ;;  %v3409_v35 = vld [vmem:[#allocation2 + $0xe0] ss:$12 sps:$4 sm:$0xff]  }
 0x5d7   : > { %v1094_v50 = vpop.f32.mrb[8].mxu1 }
 0x5d8   : > { %v3169_v51 = vpop.f32.mrb[9].mxu1  ;;  %1101 = vrot.lane.b32.xlu1 %v1094_v50, %s3634_s26  ;;  %v3396_v50 = vld [vmem:[#allocation6 + $0x68] sm:$0xff]  }
 0x5d9   : > { %v1097_v52 = vpop.f32.mrb[10].mxu1  ;;  %v3397_v51 = vld [vmem:[#allocation6 + $0x28] sm:$0xff]  }
 0x5da   : > { %v3170_v53 = vpop.f32.mrb[11].mxu1  ;;  %v3398_v52 = vld [vmem:[#allocation6 + $0x70] sm:$0xff]  }
 0x5db   : > { %v3399_v53 = vld [vmem:[#allocation6 + $0x30] sm:$0xff]  }
 0x60c   : > { %v1048_v54 = vpop.f32.mrb[8].mxu0 }
 0x60d   : > { %v3163_v55 = vpop.f32.mrb[9].mxu0 }
 0x60e   : > { %v1051_v56 = vpop.f32.mrb[10].mxu0  ;;  %v3401_v55 = vld [vmem:[#allocation6 + $0x38] sm:$0xff]  }
 0x60f   : > { %v3164_v57 = vpop.f32.mrb[11].mxu0  ;;  %v1262_v56 = vld [vmem:[%s4199_s10] sm:$0x3] }
 0x610   : > { %v1267_v57 = vrot.slane %v1262_v56, %v3887_v45 }
 0x64a   : > { %v1102_v58 = vpop.permute.xlu1 %1101 }
 0x64b   : > { %v1104_v59 = vsel %vm889_vm1, %v1048_v54, %v1102_v58  ;;  %v3400_v54 = vld [vmem:[#allocation6 + $0x78] sm:$0xff]   ;;  %v1271_v58 = vrot.slane %v1262_v56, %v3881_v43  ;;  %v3425_v56 = vld [vmem:[#allocation2 + $0x140] ss:$12 sps:$4 sm:$0xff]  }
 0x64c   : > { %v1105_v60 = vpack.c.bf16 %v1104_v59, %v1104_v59 }
 0x64e   : > { %3188 = vmatmul.mubr.bf16.vlgmr.msra.gmra.mrb[12].mxu0 %v1105_v60 }
 0x64f   : > { %3049 = vmatpush3.bf16.msra.mxu0 %v3387_v36  ;;  %v3406_v36 = vld [vmem:[#allocation2 + $0xd8] ss:$12 sps:$4 sm:$0xff]  }
 0x650   : > { %3050 = vmatprep.subr.bf16.mxu0 %v3388_v37  ;;  %v3412_v37 = vld [vmem:[#allocation2 + $0xf4] ss:$12 sps:$4 sm:$0xff]  }
 0x653   : > { %3051 = vmatpush3.bf16.msra.mxu0 %v3389_v38  ;;  %v3410_v38 = vld [vmem:[#allocation2 + $0xf0] ss:$12 sps:$4 sm:$0xff]  }
 0x654   : > { %3052 = vmatprep.subr.bf16.mxu0 %v3390_v40 }
 0x657   : > { %3053 = vmatpush3.bf16.msra.mxu0 %v3391_v41 }
 0x658   : > { %3054 = vmatprep.subr.bf16.mxu0 %v3392_v44 }
 0x65b   : > { %3055 = vmatpush3.bf16.msra.mxu0 %v3393_v47  ;;  %v3413_v47 = vld [vmem:[#allocation2 + $0xf8] ss:$12 sps:$4 sm:$0xff]  }
 0x65c   : > { %3056 = vmatprep.subr.bf16.mxu0 %v3394_v48  ;;  %v3416_v48 = vld [vmem:[#allocation2 + $0x10c] ss:$12 sps:$4 sm:$0xff]  }
 0x65f   : > { %3057 = vmatpush3.bf16.msra.mxu0 %v3395_v49  ;;  %v3414_v49 = vld [vmem:[#allocation2 + $0x108] ss:$12 sps:$4 sm:$0xff]  }
 0x660   : > { %3058 = vmatprep.subr.bf16.mxu0 %v3396_v50  ;;  %v3417_v50 = vld [vmem:[#allocation2 + $0x110] ss:$12 sps:$4 sm:$0xff]  }
 0x663   : > { %3059 = vmatpush3.bf16.msra.mxu0 %v3397_v51  ;;  %v3420_v51 = vld [vmem:[#allocation2 + $0x124] ss:$12 sps:$4 sm:$0xff]  }
 0x664   : > { %3060 = vmatprep.subr.bf16.mxu0 %v3398_v52  ;;  %v3418_v52 = vld [vmem:[#allocation2 + $0x120] ss:$12 sps:$4 sm:$0xff]  }
 0x667   : > { %3061 = vmatpush3.bf16.msra.mxu0 %v3399_v53  ;;  %v3421_v53 = vld [vmem:[#allocation2 + $0x128] ss:$12 sps:$4 sm:$0xff]  }
 0x668   : > { %3062 = vmatprep.subr.bf16.mxu0 %v3400_v54  ;;  %v3424_v54 = vld [vmem:[#allocation2 + $0x13c] ss:$12 sps:$4 sm:$0xff]  }
 0x66b   : > { %3063 = vmatpush3.bf16.msra.mxu0 %v3401_v55  ;;  %v3422_v55 = vld [vmem:[#allocation2 + $0x138] ss:$12 sps:$4 sm:$0xff]  }
 0x66c   : > { %3191 = vmatprep.subr.bf16.mxu0 %v3631_v3 }
 0x721   : > { %v1211_v62 = vpop.f32.mrb[12].mxu0 }
 0x722   : > { %v1212_v63 = vadd.f32 %v2867_v61, %v1211_v62  ;;  %v3189_v0 = vpop.f32.mrb[13].mxu0 }
 0x723   : > { %v1214_v1 = vpop.f32.mrb[14].mxu0 }
 0x724   : > { %v3190_v2 = vpop.f32.mrb[15].mxu0  ;;  %v1217_v4 = vadd.f32 %v1212_v63, %v3870_v39  ;;  %v3370_v39 = vld [vmem:[%s4198_s9 + $0x24] ss:$8 sps:$4 sm:$0xff]  }
 0x725   : > { %1358 = vmatprep.subr.bf16.mxu1 %v3370_v39 }
 0x726   : > { %1220 = vadd.xlane.f32.xlu1 %v1217_v4  ;;  %1359 = vmatpush1.bf16.msra.mxu1 %v3368_v9 }
 0x727   : > { %1360 = vmatprep.subr.bf16.mxu1 %v3373_v14 }
 0x72a   : > { %1361 = vmatpush1.bf16.msra.mxu1 %v3371_v15 }
 0x72b   : > { %1362 = vmatprep.subr.bf16.mxu1 %v3376_v16 }
 0x72e   : > { %1363 = vmatpush1.bf16.msra.mxu1 %v3374_v17 }
 0x72f   : > { %1364 = vmatprep.subr.bf16.mxu1 %v3379_v18 }
 0x732   : > { %1365 = vmatpush1.bf16.msra.mxu1 %v3377_v19 }
 0x733   : > { %1366 = vmatprep.subr.bf16.mxu1 %v3382_v20 }
 0x736   : > { %1367 = vmatpush1.bf16.msra.mxu1 %v3380_v21 }
 0x737   : > { %1368 = vmatprep.subr.bf16.mxu1 %v3385_v22  ;;  %v2894_v22 = vld [vmem:[%s4201_s12] ss:$0 sm:$0xff] }
 0x73a   : > { %1369 = vmatpush1.bf16.msra.mxu1 %v3383_v23 }
 0x7b3   : > { %v1221_v10 = vpop.xlane.xlu1 %1220 }
 0x7b4   : > { %v1222_v11 = vmul.f32 0.0078125, %v1221_v10 }
 0x7b6   : > { %v1223_v12 = vsub.f32 %v1217_v4, %v1222_v11 }
 0x7b8   : > { %v1224_v13 = vmul.f32 %v1223_v12, %v1223_v12 }
 0x7ba   : > { %1225 = vadd.xlane.f32.xlu0 %v1224_v13 }
 0x847   : > { %v1226_v24 = vpop.xlane.xlu0 %1225 }
 0x848   : > { %v1227_v26 = vmul.f32 0.0078125, %v1226_v24 }
 0x84a   : > { %v1228_v27 = vadd.f32 1e-12, %v1227_v26 }
 0x84c   : > { %3500 = vrsqrt.f32 %v1228_v27 }
 0x856   : > { %v3501_v28 = vpop.eup %3500 }
 0x857   : > { %v1230_v30 = vmul.f32 %v3501_v28, %v1223_v12 }
 0x859   : > { %v1237_v32 = vmul.f32 %v2876_v29, %v1230_v30  ;;  %v3402_v30 = vld [vmem:[#allocation2 + $0xc0] ss:$12 sps:$4 sm:$0xff]  }
 0x85b   : > { %v3986_v33 = vadd.f32 %v2877_v31, %v1237_v32  ;;  %v3404_v31 = vld [vmem:[#allocation2 + $0xc4] ss:$12 sps:$4 sm:$0xff]   ;;  %v3405_v32 = vld [vmem:[#allocation2 + $0xc8] ss:$12 sps:$4 sm:$0xff]  }
 0x85c   : > { %1798 = vmatprep.subr.bf16.mxu1 %v3404_v31 }
 0x85d   : > { %v1245_v34 = vpack.c.bf16 %v3986_v33, %v3986_v33 }
 0x85f   : > { %1387 = vmatmul.mubr.bf16.vlgmr.msra.gmra.mrb[12].mxu1 %v1245_v34  ;;  %v3408_v34 = vld [vmem:[#allocation2 + $0xdc] ss:$12 sps:$4 sm:$0xff]  }
 0x860   : > { %1830 = vmatprep.mubr.bf16.mxu1 %v3632_v25  ;;  %1799 = vmatpush1.bf16.msra.mxu1 %v3402_v30 }
 0x861   : > { %1800 = vmatprep.subr.bf16.mxu1 %v3408_v34 }
 0x864   : > { %1801 = vmatpush1.bf16.msra.mxu1 %v3406_v36 }
 0x865   : > { %1802 = vmatprep.subr.bf16.mxu1 %v3412_v37 }
 0x868   : > { %1803 = vmatpush1.bf16.msra.mxu1 %v3410_v38 }
 0x869   : > { %1804 = vmatprep.subr.bf16.mxu1 %v3416_v48 }
 0x86c   : > { %1805 = vmatpush1.bf16.msra.mxu1 %v3414_v49 }
 0x86d   : > { %1806 = vmatprep.subr.bf16.mxu1 %v3420_v51 }
 0x870   : > { %1807 = vmatpush1.bf16.msra.mxu1 %v3418_v52 }
 0x871   : > { %1808 = vmatprep.subr.bf16.mxu1 %v3424_v54 }
 0x874   : > { %1809 = vmatpush1.bf16.msra.mxu1 %v3422_v55 }
 0x932   : > { %v1388_v59 = vpop.f32.mrb[12].mxu1 }
 0x933   : > { %v1389_v60 = vadd.f32 %v1388_v59, %v1267_v57  ;;  %v1390_v61 = vpop.f32.mrb[13].mxu1  ;;  %v3428_v57 = vld [vmem:[#allocation2 + $0x154] ss:$12 sps:$4 sm:$0xff]   ;;  %v3429_v59 = vld [vmem:[#allocation2 + $0x158] ss:$12 sps:$4 sm:$0xff]  }
 0x934   : > { %v1391_v62 = vadd.f32 %v1390_v61, %v1271_v58  ;;  %v1392_v63 = vpop.f32.mrb[14].mxu1  ;;  %v3426_v58 = vld [vmem:[#allocation2 + $0x150] ss:$12 sps:$4 sm:$0xff]   ;;  %1810 = vmatprep.subr.bf16.mxu1 %v3428_v57  ;;  %v3430_v61 = vld [vmem:[#allocation2 + $0x168] ss:$12 sps:$4 sm:$0xff]  }
 0x935   : > { %v1395_v0 = vmul.f32 %v1389_v60, %v1389_v60  ;;  %v1393_v1 = vpop.f32.mrb[15].mxu1  ;;  %1811 = vmatpush1.bf16.msra.mxu1 %v3426_v58 }
 0x936   : > { %v1396_v2 = vmul.f32 %v1391_v62, %v1391_v62 }
 0x937   : > { %v1397_v4 = vmul.f32 %v1395_v0, %v1389_v60 }
 0x938   : > { %v1398_v5 = vmul.f32 %v1396_v2, %v1391_v62 }
 0x939   : > { %v1399_v6 = vmul.f32 0.044715, %v1397_v4  ;;  %v2911_v4 = vld [vmem:[%s4202_s13] ss:$0 sm:$0xff] }
 0x93a   : > { %v1400_v7 = vmul.f32 0.044715, %v1398_v5 }
 0x93b   : > { %v1401_v8 = vadd.f32 %v1399_v6, %v1389_v60  ;;  %v2912_v6 = vld [vmem:[%s4203_s14] ss:$0 sm:$0xff] }
 0x93c   : > { %v1402_v39 = vadd.f32 %v1400_v7, %v1391_v62 }
 0x93d   : > { %v1403_v9 = vmul.f32 0.7978846, %v1401_v8 }
 0x93e   : > { %v1404_v10 = vmul.f32 0.7978846, %v1402_v39 }
 0x93f   : > { %3502 = vtanh.f32 %v1403_v9  ;;  %v2913_v9 = vld [vmem:[%s4193_s4 + $0x3] sm:$0x7] }
 0x940   : > { %3504 = vtanh.f32 %v1404_v10  ;;  %v1658_v10 = vrot.slane %v2913_v9, %v3887_v45 }
 0x949   : > { %v3503_v11 = vpop.eup %3502 }
 0x94a   : > { %v3505_v12 = vpop.eup %3504  ;;  %v1407_v13 = vadd.f32 1.0, %v3503_v11  ;;  %v1662_v11 = vrot.slane %v2913_v9, %v3881_v43 }
 0x94b   : > { %v1408_v14 = vadd.f32 1.0, %v3505_v12 }
 0x94c   : > { %v1409_v15 = vmul.f32 0.5, %v1407_v13 }
 0x94d   : > { %v1410_v16 = vmul.f32 0.5, %v1408_v14 }
 0x94e   : > { %v1411_v17 = vmul.f32 %v1409_v15, %v1389_v60  ;;  %v3432_v60 = vld [vmem:[#allocation2 + $0x16c] ss:$12 sps:$4 sm:$0xff]  }
 0x94f   : > { %v1412_v18 = vmul.f32 %v1410_v16, %v1391_v62  ;;  %v3433_v62 = vld [vmem:[#allocation2 + $0x170] ss:$12 sps:$4 sm:$0xff]   ;;  %1812 = vmatprep.subr.bf16.mxu1 %v3432_v60 }
 0x950   : > { %v1413_v20 = vpack.c.bf16 %v1411_v17, %v1411_v17  ;;  %1813 = vmatpush1.bf16.msra.mxu1 %v3430_v61 }
 0x951   : > { %v1414_v19 = vpack.c.bf16 %v1412_v18, %v1412_v18  ;;  %3211 = vmatprep.subr.bf16.mxu1 %v3631_v3 }
 0x953   : > { %1582 = vmatprep.mubr.bf16.mxu0 %v1414_v19 }
 0x954   : > { %1583 = vmatmul.mubr.bf16.vlgmr.msra.gmra.mrb[16].mxu0 %v1413_v20 }
 0x955   : > { %3207 = vmatprep.mubr.msk.bf16.mxu0 %vm3633_vm0, %v3631_v3  ;;  %3192 = vmatpush3.bf16.msra.mxu0 %v3405_v32 }
 0x956   : > { %3193 = vmatprep.subr.bf16.mxu0 %v3631_v3 }
 0x959   : > { %3194 = vmatpush3.bf16.msra.mxu0 %v3409_v35 }
 0x95a   : > { %3195 = vmatprep.subr.bf16.mxu0 %v3631_v3 }
 0x95d   : > { %3196 = vmatpush3.bf16.msra.mxu0 %v3413_v47 }
 0x95e   : > { %3197 = vmatprep.subr.bf16.mxu0 %v3631_v3 }
 0x961   : > { %3198 = vmatpush3.bf16.msra.mxu0 %v3417_v50 }
 0x962   : > { %3199 = vmatprep.subr.bf16.mxu0 %v3631_v3 }
 0x965   : > { %3200 = vmatpush3.bf16.msra.mxu0 %v3421_v53 }
 0x966   : > { %3201 = vmatprep.subr.bf16.mxu0 %v3631_v3 }
 0x969   : > { %3202 = vmatpush3.bf16.msra.mxu0 %v3425_v56 }
 0x96a   : > { %3203 = vmatprep.subr.bf16.mxu0 %v3631_v3 }
 0x96d   : > { %3204 = vmatpush3.bf16.msra.mxu0 %v3429_v59 }
 0x96e   : > { %3205 = vmatprep.subr.bf16.mxu0 %v3631_v3 }
 0x971   : > { %3206 = vmatpush3.bf16.msra.mxu0 %v3433_v62 }
 0x972   : > { %3235 = vmatprep.subr.bf16.mxu0 %v3631_v3 }
 0xa27   : > { %v3064_v21 = vpop.f32.mrb[16].mxu0 }
 0xa28   : > { %v3065_v23 = vpop.f32.mrb[17].mxu0 }
 0xa29   : > { %v3066_v24 = vadd.f32 %v3065_v23, %v3064_v21  ;;  %v3067_v26 = vpop.f32.mrb[18].mxu0 }
 0xa2a   : > { %v3068_v27 = vpop.f32.mrb[19].mxu0  ;;  %v1666_v26 = vrot.slane %v2913_v9, %v663_v46 }
 0xa2b   : > { %v1585_v28 = vadd.f32 %v3066_v24, %v2894_v22 }
 0xa2d   : > { %v1590_v29 = vadd.f32 %v1585_v28, %v3986_v33 }
 0xa2f   : > { %1593 = vadd.xlane.f32.xlu0 %v1590_v29 }
 0xabc   : > { %v1594_v33 = vpop.xlane.xlu0 %1593 }
 0xabd   : > { %v1595_v40 = vmul.f32 0.0078125, %v1594_v33 }
 0xabf   : > { %v1596_v41 = vsub.f32 %v1590_v29, %v1595_v40 }
 0xac1   : > { %v1597_v44 = vmul.f32 %v1596_v41, %v1596_v41 }
 0xac3   : > { %1598 = vadd.xlane.f32.xlu0 %v1597_v44 }
 0xb50   : > { %v1599_v63 = vpop.xlane.xlu0 %1598 }
 0xb51   : > { %v1600_v0 = vmul.f32 0.0078125, %v1599_v63 }
 0xb53   : > { %v1601_v1 = vadd.f32 1e-12, %v1600_v0 }
 0xb55   : > { %3506 = vrsqrt.f32 %v1601_v1 }
 0xb5f   : > { %v3507_v2 = vpop.eup %3506 }
 0xb60   : > { %v1603_v5 = vmul.f32 %v3507_v2, %v1596_v41  ;;  %v3434_v2 = vld [vmem:[#allocation4 + $0x40] sm:$0xff]  }
 0xb62   : > { %v1610_v7 = vmul.f32 %v2911_v4, %v1603_v5  ;;  %v3435_v4 = vld [vmem:[#allocation4 + $0x48] sm:$0xff]   ;;  %v3436_v5 = vld [vmem:[#allocation4 + $0x50] sm:$0xff]  }
 0xb64   : > { %v4018_v8 = vadd.f32 %v2912_v6, %v1610_v7  ;;  %v3437_v7 = vld [vmem:[#allocation4 + $0x58] sm:$0xff]  }
 0xb66   : > { %v1618_v39 = vpack.c.bf16 %v4018_v8, %v4018_v8 }
 0xb68   : > { %1831 = vmatmul.mubr.bf16.vlgmr.msra.gmra.mrb[16].mxu1 %v1618_v39  ;;  %3208 = vmatmul.mubr.bf16.vlgmr.msra.gmra.mrb[20].mxu0 %v1618_v39 }
 0xb69   : > { %3213 = vmatprep.mubr.msk.bf16.mxu1 %vm3633_vm0, %v3631_v3  ;;  %3251 = vmatprep.mubr.msk.bf16.mxu0 %vm3633_vm0, %v3631_v3 }
 0xb6a   : > { %3236 = vmatpush3.bf16.msra.mxu0 %v3434_v2  ;;  %v3471_v2 = vld [vmem:[#allocation6 + $0x90] sm:$0xff]  }
 0xb6b   : > { %3237 = vmatprep.subr.bf16.mxu0 %v3631_v3 }
 0xb6e   : > { %3238 = vmatpush3.bf16.msra.mxu0 %v3435_v4  ;;  %v3472_v4 = vld [vmem:[#allocation6 + $0xd8] sm:$0xff]  }
 0xb6f   : > { %3239 = vmatprep.subr.bf16.mxu0 %v3631_v3 }
 0xb72   : > { %3240 = vmatpush3.bf16.msra.mxu0 %v3436_v5  ;;  %v3473_v5 = vld [vmem:[#allocation6 + $0x98] sm:$0xff]  }
 0xb73   : > { %3241 = vmatprep.subr.bf16.mxu0 %v3631_v3 }
 0xb76   : > { %3242 = vmatpush3.bf16.msra.mxu0 %v3437_v7  ;;  %v3475_v7 = vld [vmem:[#allocation6 + $0xa0] sm:$0xff]  }
 0xb77   : > { %3243 = vmatprep.subr.bf16.mxu0 %v3631_v3 }
 0xc3b   : > { %v1832_v12 = vpop.f32.mrb[16].mxu1  ;;  %v1873_v13 = vpop.f32.mrb[20].mxu0 }
 0xc3c   : > { %v1833_v14 = vadd.f32 %v1832_v12, %v1658_v10  ;;  %v1834_v15 = vpop.f32.mrb[17].mxu1  ;;  %v3209_v16 = vpop.f32.mrb[21].mxu0  ;;  %v1874_v28 = vadd.f32 %v1873_v13, %v1666_v26  ;;  %v3440_v12 = vld [vmem:[#allocation4 + $0x70] sm:$0xff]   ;;  %v3441_v13 = vld [vmem:[#allocation4 + $0x78] sm:$0xff]  }
 0xc3d   : > { %v1835_v17 = vadd.f32 %v1834_v15, %v1662_v11  ;;  %v1836_v18 = vpop.f32.mrb[18].mxu1  ;;  %v1876_v19 = vpop.f32.mrb[22].mxu0  ;;  %v3438_v11 = vld [vmem:[#allocation4 + $0x60] sm:$0xff]  }
 0xc3e   : > { %v1879_v20 = vpack.c.bf16 %v1833_v14, %v1833_v14  ;;  %v1837_v21 = vpop.f32.mrb[19].mxu1  ;;  %v3210_v22 = vpop.f32.mrb[23].mxu0  ;;  %v1881_v30 = vpack.c.bf16 %v1874_v28, %v1874_v28  ;;  %3244 = vmatpush3.bf16.msra.mxu0 %v3438_v11  ;;  %v3479_v11 = vld [vmem:[#allocation6 + $0xb0] sm:$0xff]  }
 0xc3f   : > { %v1880_v23 = vpack.c.bf16 %v1835_v17, %v1835_v17  ;;  %3245 = vmatprep.subr.bf16.mxu0 %v3631_v3  ;;  %v2943_v21 = vld [vmem:[%s4195_s6 + $0x1] ss:$0 sm:$0xff] }
 0xc40   : > { %1883 = vrot.lane.b32.xlu1 %v1879_v20, %s3634_s26  ;;  %v2011_v32 = vsel %vm1010_vm2, %v1881_v30, 0 }
 0xc41   : > { %v1895_v24 = vsel %vm889_vm1, %v1880_v23, 0  ;;  %1886 = vrot.lane.b32.xlu0 %v1880_v23, %s3634_s26 }
 0xc42   : > { %3212 = vmatpush3.bf16.xpose.msra.mxu1 %v1895_v24 }
 0xc43   : > { %3217 = vmatprep.subr.bf16.mxu1 %v3631_v3 }
 0xc49   : > { %3214 = vmatmul.mubr.msk.bf16.vlgmr.msra.gmra.mrb[20].mxu1 %vm889_vm1, %v1879_v20 }
 0xc4a   : > { %3219 = vmatprep.mubr.msk.bf16.mxu1 %vm3633_vm0, %v3631_v3 }
 0xcb2   : > { %v1884_v31 = vpop.permute.xlu1 %1883 }
 0xcb3   : > { %v1887_v27 = vpop.permute.xlu0 %1886 }
 0xcb4   : > { %v1941_v29 = vsel %vm889_vm1, %v1887_v27, 0 }
 0xcb5   : > { %3218 = vmatpush3.bf16.xpose.msra.mxu1 %v1941_v29  ;;  %v3442_v29 = vld [vmem:[%s4198_s9 + $0x80] ss:$8 sps:$4 sm:$0xff]  }
 0xcb6   : > { %3223 = vmatprep.subr.bf16.mxu1 %v3631_v3 }
 0xcbc   : > { %3220 = vmatmul.mubr.msk.bf16.vlgmr.msra.gmra.mrb[24].mxu1 %vm889_vm1, %v1884_v31  ;;  %v3447_v31 = vld [vmem:[%s4198_s9 + $0x94] ss:$8 sps:$4 sm:$0xff]  }
 0xcbd   : > { %3224 = vmatpush3.bf16.msra.mxu1 %v2011_v32  ;;  %3225 = vmatprep.mubr.msk.bf16.mxu1 %vm3633_vm0, %v3631_v3  ;;  %v3445_v32 = vld [vmem:[%s4198_s9 + $0x90] ss:$8 sps:$4 sm:$0xff]  }
 0xcbe   : > { %3229 = vmatprep.subr.bf16.mxu1 %v3631_v3 }
 0xd1c   : > { %v1931_v42 = vpop.f32.mrb[20].mxu1 }
 0xd1d   : > { %v3215_v46 = vpop.f32.mrb[21].mxu1  ;;  %v1983_v34 = vsel %vm982_vm3, %v1931_v42, -inf }
 0xd1e   : > { %1984 = vmax.xlane.f32.xlu0 %v1983_v34  ;;  %v1934_v35 = vpop.f32.mrb[22].mxu1 }
 0xd1f   : > { %v3216_v36 = vpop.f32.mrb[23].mxu1 }
 0xd8f   : > { %v1977_v37 = vpop.f32.mrb[24].mxu1 }
 0xd90   : > { %v3221_v38 = vpop.f32.mrb[25].mxu1  ;;  %v1986_v33 = vsel %vm982_vm3, %v1977_v37, -inf }
 0xd91   : > { %1987 = vmax.xlane.f32.xlu1 %v1986_v33  ;;  %v1980_v40 = vpop.f32.mrb[26].mxu1  ;;  %v3451_v38 = vld [vmem:[%s4198_s9 + $0xb0] ss:$8 sps:$4 sm:$0xff]   ;;  %v3456_v33 = vld [vmem:[%s4198_s9 + $0xc4] ss:$8 sps:$4 sm:$0xff]  }
 0xd92   : > { %v3222_v41 = vpop.f32.mrb[27].mxu1  ;;  %v3454_v40 = vld [vmem:[%s4198_s9 + $0xc0] ss:$8 sps:$4 sm:$0xff]  }
 0xd93   : > { %v3459_v41 = vld [vmem:[%s4198_s9 + $0xd4] ss:$8 sps:$4 sm:$0xff]  }
 0xdab   : > { %v1985_v44 = vpop.xlane.xlu0 %1984 }
 0xdac   : > { %v1989_v47 = vsub.f32 %v1931_v42, %v1985_v44  ;;  %v3448_v42 = vld [vmem:[%s4198_s9 + $0xa0] ss:$8 sps:$4 sm:$0xff]   ;;  %v3457_v44 = vld [vmem:[%s4198_s9 + $0xd0] ss:$8 sps:$4 sm:$0xff]  }
 0xdae   : > { %v1991_v48 = vmul.f32 1.442695, %v1989_v47  ;;  %v3462_v47 = vld [vmem:[%s4198_s9 + $0xe4] ss:$8 sps:$4 sm:$0xff]  }
 0xdb0   : > { %3508 = vpow2.f32 %v1991_v48  ;;  %v3460_v48 = vld [vmem:[%s4198_s9 + $0xe0] ss:$8 sps:$4 sm:$0xff]  }
 0xdba   : > { %v3509_v49 = vpop.eup %3508 }
 0xdbb   : > { %v1995_v50 = vsel %vm982_vm3, %v3509_v49, 0.0 }
 0xdbc   : > { %1996 = vadd.xlane.f32.xlu0 %v1995_v50  ;;  %v3463_v50 = vld [vmem:[%s4198_s9 + $0xf0] ss:$8 sps:$4 sm:$0xff]  }
 0xe1e   : > { %v1988_v51 = vpop.xlane.xlu1 %1987 }
 0xe1f   : > { %v1990_v52 = vsub.f32 %v1977_v37, %v1988_v51  ;;  %v3453_v37 = vld [vmem:[%s4198_s9 + $0xb4] ss:$8 sps:$4 sm:$0xff]  }
 0xe21   : > { %v1993_v53 = vmul.f32 1.442695, %v1990_v52 }
 0xe23   : > { %3510 = vpow2.f32 %v1993_v53 }
 0xe2d   : > { %v3511_v54 = vpop.eup %3510 }
 0xe2e   : > { %v1998_v55 = vsel %vm982_vm3, %v3511_v54, 0.0 }
 0xe2f   : > { %1999 = vadd.xlane.f32.xlu0 %v1998_v55  ;;  %v2954_v55 = vld [vmem:[%s4196_s7 + $0x1] ss:$0 sm:$0xff] }
 0xe45   : > { %1889 = vrot.lane.b32.xlu0 %v1881_v30, %s3634_s26  ;;  %v3444_v30 = vld [vmem:[%s4198_s9 + $0x84] ss:$8 sps:$4 sm:$0xff]  }
 0xe49   : > { %v1997_v56 = vpop.xlane.xlu0 %1996 }
 0xe4a   : > { %3512 = vrcp.f32 %v1997_v56 }
 0xe54   : > { %v3513_v57 = vpop.eup %3512 }
 0xe55   : > { %v2003_v58 = vmul.f32 %v3513_v57, %v3509_v49  ;;  %v3465_v49 = vld [vmem:[%s4198_s9 + $0xf4] ss:$8 sps:$4 sm:$0xff]   ;;  %v2955_v57 = vld [vmem:[%s4197_s8 + $0x1] ss:$0 sm:$0xff] }
 0xe57   : > { %v2005_v59 = vpack.c.bf16 %v2003_v58, %v2003_v58 }
 0xe59   : > { %3226 = vmatmul.mubr.msk.bf16.vlgmr.msra.gmra.mrb[28].mxu1 %vm982_vm3, %v2005_v59 }
 0xe5a   : > { %3231 = vmatprep.mubr.msk.bf16.mxu1 %vm3633_vm0, %v3631_v3 }
 0xebc   : > { %v2000_v60 = vpop.xlane.xlu0 %1999 }
 0xebd   : > { %3514 = vrcp.f32 %v2000_v60 }
 0xec0   : > { %v1890_v61 = vpop.permute.xlu0 %1889 }
 0xec1   : > { %v2057_v62 = vsel %vm1010_vm2, %v1890_v61, 0  ;;  %v3466_v61 = vld [vmem:[#allocation6 + $0xc0] sm:$0xff]  }
 0xec2   : > { %3230 = vmatpush3.bf16.msra.mxu1 %v2057_v62  ;;  %v3467_v62 = vld [vmem:[#allocation6 + $0x80] sm:$0xff]  }
 0xec3   : > { %2359 = vmatprep.subr.bf16.mxu1 %v3444_v30 }
 0xec7   : > { %v3515_v63 = vpop.eup %3514 }
 0xec8   : > { %v2004_v0 = vmul.f32 %v3515_v63, %v3511_v54  ;;  %v3468_v63 = vld [vmem:[#allocation6 + $0xc8] sm:$0xff]  }
 0xeca   : > { %v2006_v1 = vpack.c.bf16 %v2004_v0, %v2004_v0  ;;  %v3469_v0 = vld [vmem:[#allocation6 + $0x88] sm:$0xff]  }
 0xecc   : > { %3232 = vmatmul.mubr.msk.bf16.vlgmr.msra.gmra.mrb[32].mxu1 %vm982_vm3, %v2006_v1  ;;  %v3470_v1 = vld [vmem:[#allocation6 + $0xd0] sm:$0xff]  }
 0xecd   : > { %2391 = vmatprep.mubr.bf16.mxu1 %v3632_v25  ;;  %v3439_v25 = vld [vmem:[#allocation4 + $0x68] sm:$0xff]   ;;  %2360 = vmatpush1.bf16.msra.mxu1 %v3442_v29 }
 0xece   : > { %3246 = vmatpush3.bf16.msra.mxu0 %v3439_v25  ;;  %2361 = vmatprep.subr.bf16.mxu1 %v3447_v31  ;;  %v3480_v25 = vld [vmem:[#allocation6 + $0xf8] sm:$0xff]  }
 0xecf   : > { %3247 = vmatprep.subr.bf16.mxu0 %v3631_v3 }
 0xed1   : > { %2362 = vmatpush1.bf16.msra.mxu1 %v3445_v32 }
 0xed2   : > { %3248 = vmatpush3.bf16.msra.mxu0 %v3440_v12  ;;  %v3481_v12 = vld [vmem:[#allocation6 + $0xb8] sm:$0xff]  }
 0xed3   : > { %3249 = vmatprep.subr.bf16.mxu0 %v3631_v3 }
 0xed6   : > { %3250 = vmatpush3.bf16.msra.mxu0 %v3441_v13  ;;  %v2972_v13 = vld [vmem:[%s4199_s10 + $0x2] sm:$0x3] }
 0xed7   : > { %3096 = vmatprep.subr.bf16.mxu0 %v3466_v61  ;;  %v3488_v61 = vld [vmem:[%s4229_s1 + $0x30] sm:$0xff]  }
 0xf2c   : > { %v2047_v6 = vpop.f32.mrb[28].mxu1 }
 0xf2d   : > { %v3227_v39 = vpop.f32.mrb[29].mxu1 }
 0xf2e   : > { %v2050_v9 = vpop.f32.mrb[30].mxu1  ;;  %v3476_v39 = vld [vmem:[#allocation6 + $0xe8] sm:$0xff]  }
 0xf2f   : > { %v3228_v10 = vpop.f32.mrb[31].mxu1  ;;  %v3477_v9 = vld [vmem:[#allocation6 + $0xa8] sm:$0xff]  }
 0xf30   : > { %v3478_v10 = vld [vmem:[#allocation6 + $0xf0] sm:$0xff]  }
 0xf9f   : > { %v2093_v14 = vpop.f32.mrb[32].mxu1 }
 0xfa0   : > { %2100 = vrot.lane.b32.xlu1 %v2093_v14, %s3634_s26  ;;  %v3233_v15 = vpop.f32.mrb[33].mxu1  ;;  %v2272_v14 = vrot.slane %v2972_v13, %v3887_v45  ;;  %s4230_s26 = sld [smem:[#allocation13_spill]] }
 0xfa1   : > { %v2096_v16 = vpop.f32.mrb[34].mxu1  ;;  %v2276_v15 = vrot.slane %v2972_v13, %v3881_v43 }
 0xfa2   : > { %v3234_v17 = vpop.f32.mrb[35].mxu1 }
0x1012   : > { %v2101_v18 = vpop.permute.xlu1 %2100 }
0x1013   : > { %v2103_v19 = vsel %vm889_vm1, %v2047_v6, %v2101_v18  ;;  %v3474_v6 = vld [vmem:[#allocation6 + $0xe0] sm:$0xff]  }
0x1014   : > { %v2104_v20 = vpack.c.bf16 %v2103_v19, %v2103_v19 }
0x1016   : > { %3252 = vmatmul.mubr.bf16.vlgmr.msra.gmra.mrb[24].mxu0 %v2104_v20 }
0x1017   : > { %3097 = vmatpush3.bf16.msra.mxu0 %v3467_v62  ;;  %v3489_v62 = vld [vmem:[%s4229_s1 + $0x38] sm:$0xff]  }
0x1018   : > { %3098 = vmatprep.subr.bf16.mxu0 %v3468_v63 }
0x101b   : > { %3099 = vmatpush3.bf16.msra.mxu0 %v3469_v0 }
0x101c   : > { %3100 = vmatprep.subr.bf16.mxu0 %v3470_v1 }
0x101f   : > { %3101 = vmatpush3.bf16.msra.mxu0 %v3471_v2 }
0x1020   : > { %3102 = vmatprep.subr.bf16.mxu0 %v3472_v4  ;;  %v3009_v4 = vld [vmem:[%s4202_s13 + $0x1] ss:$0 sm:$0xff] }
0x1023   : > { %3103 = vmatpush3.bf16.msra.mxu0 %v3473_v5 }
0x1024   : > { %3104 = vmatprep.subr.bf16.mxu0 %v3474_v6  ;;  %v3010_v6 = vld [vmem:[%s4203_s14 + $0x1] ss:$0 sm:$0xff] }
0x1027   : > { %3105 = vmatpush3.bf16.msra.mxu0 %v3475_v7 }
0x1028   : > { %3106 = vmatprep.subr.bf16.mxu0 %v3476_v39 }
0x102b   : > { %3107 = vmatpush3.bf16.msra.mxu0 %v3477_v9 }
0x102c   : > { %3108 = vmatprep.subr.bf16.mxu0 %v3478_v10 }
0x102f   : > { %3109 = vmatpush3.bf16.msra.mxu0 %v3479_v11 }
0x1030   : > { %3110 = vmatprep.subr.bf16.mxu0 %v3480_v25 }
0x1033   : > { %3111 = vmatpush3.bf16.msra.mxu0 %v3481_v12 }
0x10e9   : > { %v2212_v22 = vpop.f32.mrb[24].mxu0 }
0x10ea   : > { %v2213_v23 = vadd.f32 %v2943_v21, %v2212_v22  ;;  %v3253_v24 = vpop.f32.mrb[25].mxu0 }
0x10eb   : > { %v2215_v26 = vpop.f32.mrb[26].mxu0 }
0x10ec   : > { %v3254_v27 = vpop.f32.mrb[27].mxu0  ;;  %v2218_v28 = vadd.f32 %v2213_v23, %v4018_v8  ;;  %v3450_v8 = vld [vmem:[%s4198_s9 + $0xa4] ss:$8 sps:$4 sm:$0xff]  }
0x10ed   : > { %2363 = vmatprep.subr.bf16.mxu1 %v3450_v8 }
0x10ee   : > { %2223 = vadd.xlane.f32.xlu0 %v2218_v28  ;;  %2364 = vmatpush1.bf16.msra.mxu1 %v3448_v42 }
0x10ef   : > { %2365 = vmatprep.subr.bf16.mxu1 %v3453_v37 }
0x10f2   : > { %2366 = vmatpush1.bf16.msra.mxu1 %v3451_v38 }
0x10f3   : > { %2367 = vmatprep.subr.bf16.mxu1 %v3456_v33 }
0x10f6   : > { %2368 = vmatpush1.bf16.msra.mxu1 %v3454_v40  ;;  %v2990_v40 = vld [vmem:[%s4201_s12 + $0x1] ss:$0 sm:$0xff] }
0x10f7   : > { %2369 = vmatprep.subr.bf16.mxu1 %v3459_v41 }
0x10fa   : > { %2370 = vmatpush1.bf16.msra.mxu1 %v3457_v44 }
0x10fb   : > { %2371 = vmatprep.subr.bf16.mxu1 %v3462_v47 }
0x10fe   : > { %2372 = vmatpush1.bf16.msra.mxu1 %v3460_v48 }
0x10ff   : > { %2373 = vmatprep.subr.bf16.mxu1 %v3465_v49 }
0x1102   : > { %2374 = vmatpush1.bf16.msra.mxu1 %v3463_v50 }
0x1103   : > { %3255 = vmatprep.subr.bf16.mxu1 %v3631_v3 }
0x117b   : > { %v2224_v46 = vpop.xlane.xlu0 %2223 }
0x117c   : > { %v2225_v34 = vmul.f32 0.0078125, %v2224_v46 }
0x117e   : > { %v2226_v35 = vsub.f32 %v2218_v28, %v2225_v34 }
0x1180   : > { %v2227_v36 = vmul.f32 %v2226_v35, %v2226_v35 }
0x1182   : > { %2228 = vadd.xlane.f32.xlu1 %v2227_v36 }
0x120f   : > { %v2229_v51 = vpop.xlane.xlu1 %2228 }
0x1210   : > { %v2230_v52 = vmul.f32 0.0078125, %v2229_v51  ;;  %v3482_v51 = vld [vmem:[%s4229_s1] sm:$0xff]  }
0x1212   : > { %v2231_v53 = vadd.f32 1e-12, %v2230_v52  ;;  %v3483_v52 = vld [vmem:[%s4229_s1 + $0x8] sm:$0xff]  }
0x1214   : > { %3516 = vrsqrt.f32 %v2231_v53 }
0x121e   : > { %v3517_v54 = vpop.eup %3516 }
0x121f   : > { %v2233_v56 = vmul.f32 %v3517_v54, %v2226_v35 }
0x1221   : > { %v2240_v58 = vmul.f32 %v2954_v55, %v2233_v56 }
0x1223   : > { %v4126_v59 = vadd.f32 %v2955_v57, %v2240_v58  ;;  %v3484_v57 = vld [vmem:[%s4229_s1 + $0x10] sm:$0xff]   ;;  %v3485_v58 = vld [vmem:[%s4229_s1 + $0x18] sm:$0xff]  }
0x1225   : > { %v2248_v60 = vpack.c.bf16 %v4126_v59, %v4126_v59 }
0x1227   : > { %2392 = vmatmul.mubr.bf16.vlgmr.msra.gmra.mrb[36].mxu1 %v2248_v60  ;;  %v3487_v60 = vld [vmem:[%s4229_s1 + $0x28] sm:$0xff]  }
0x1228   : > { %3271 = vmatprep.mubr.msk.bf16.mxu1 %vm3633_vm0, %v3631_v3  ;;  %3256 = vmatpush3.bf16.msra.mxu1 %v3482_v51 }
0x1229   : > { %3257 = vmatprep.subr.bf16.mxu1 %v3631_v3 }
0x122c   : > { %3258 = vmatpush3.bf16.msra.mxu1 %v3483_v52 }
0x122d   : > { %3259 = vmatprep.subr.bf16.mxu1 %v3631_v3 }
0x1230   : > { %3260 = vmatpush3.bf16.msra.mxu1 %v3484_v57 }
0x1231   : > { %3261 = vmatprep.subr.bf16.mxu1 %v3631_v3 }
0x1234   : > { %3262 = vmatpush3.bf16.msra.mxu1 %v3485_v58 }
0x1235   : > { %3263 = vmatprep.subr.bf16.mxu1 %v3631_v3 }
0x12fa   : > { %v2393_v16 = vpop.f32.mrb[36].mxu1 }
0x12fb   : > { %v2394_v17 = vadd.f32 %v2393_v16, %v2272_v14  ;;  %v2395_v18 = vpop.f32.mrb[37].mxu1 }
0x12fc   : > { %v2396_v19 = vadd.f32 %v2395_v18, %v2276_v15  ;;  %v2397_v20 = vpop.f32.mrb[38].mxu1 }
0x12fd   : > { %v2400_v21 = vmul.f32 %v2394_v17, %v2394_v17  ;;  %v2398_v22 = vpop.f32.mrb[39].mxu1 }
0x12fe   : > { %v2401_v23 = vmul.f32 %v2396_v19, %v2396_v19 }
0x12ff   : > { %v2402_v24 = vmul.f32 %v2400_v21, %v2394_v17 }
0x1300   : > { %v2403_v26 = vmul.f32 %v2401_v23, %v2396_v19 }
0x1301   : > { %v2404_v27 = vmul.f32 0.044715, %v2402_v24 }
0x1302   : > { %v2405_v28 = vmul.f32 0.044715, %v2403_v26 }
0x1303   : > { %v2406_v29 = vadd.f32 %v2404_v27, %v2394_v17 }
0x1304   : > { %v2407_v30 = vadd.f32 %v2405_v28, %v2396_v19 }
0x1305   : > { %v2408_v31 = vmul.f32 0.7978846, %v2406_v29 }
0x1306   : > { %v2409_v32 = vmul.f32 0.7978846, %v2407_v30 }
0x1307   : > { %3518 = vtanh.f32 %v2408_v31 }
0x1308   : > { %3520 = vtanh.f32 %v2409_v32 }
0x1311   : > { %v3519_v45 = vpop.eup %3518 }
0x1312   : > { %v3521_v43 = vpop.eup %3520  ;;  %v2412_v8 = vadd.f32 1.0, %v3519_v45 }
0x1313   : > { %v2413_v42 = vadd.f32 1.0, %v3521_v43 }
0x1314   : > { %v2414_v46 = vmul.f32 0.5, %v2412_v8 }
0x1315   : > { %v2415_v34 = vmul.f32 0.5, %v2413_v42 }
0x1316   : > { %v2416_v35 = vmul.f32 %v2414_v46, %v2394_v17 }
0x1317   : > { %v2417_v36 = vmul.f32 %v2415_v34, %v2396_v19 }
0x1318   : > { %v2418_v38 = vpack.c.bf16 %v2416_v35, %v2416_v35 }
0x1319   : > { %v2419_v37 = vpack.c.bf16 %v2417_v36, %v2417_v36 }
0x131b   : > { %2589 = vmatprep.mubr.bf16.mxu0 %v2419_v37 }
0x131c   : > { %2590 = vmatmul.mubr.bf16.vlgmr.msra.gmra.mrb[28].mxu0 %v2418_v38 }
0x13ef   : > { %v3112_v33 = vpop.f32.mrb[28].mxu0 }
0x13f0   : > { %v3113_v41 = vpop.f32.mrb[29].mxu0 }
0x13f1   : > { %v3114_v44 = vadd.f32 %v3113_v41, %v3112_v33  ;;  %v3115_v47 = vpop.f32.mrb[30].mxu0 }
0x13f2   : > { %v3116_v48 = vpop.f32.mrb[31].mxu0 }
0x13f3   : > { %v2592_v49 = vadd.f32 %v3114_v44, %v2990_v40 }
0x13f5   : > { %v2597_v50 = vadd.f32 %v2592_v49, %v4126_v59  ;;  %v3486_v59 = vld [vmem:[%s4229_s1 + $0x20] sm:$0xff]  }
0x13f6   : > { %3264 = vmatpush3.bf16.msra.mxu1 %v3486_v59 }
0x13f7   : > { %2602 = vadd.xlane.f32.xlu0 %v2597_v50  ;;  %3265 = vmatprep.subr.bf16.mxu1 %v3631_v3 }
0x13fa   : > { %3266 = vmatpush3.bf16.msra.mxu1 %v3487_v60 }
0x13fb   : > { %3267 = vmatprep.subr.bf16.mxu1 %v3631_v3 }
0x13fe   : > { %3268 = vmatpush3.bf16.msra.mxu1 %v3488_v61 }
0x13ff   : > { %3269 = vmatprep.subr.bf16.mxu1 %v3631_v3  ;;  %v3011_v3 = vld [vmem:[%s4230_s26] ss:$0 sm:$0xff] }
0x1402   : > { %3270 = vmatpush3.bf16.msra.mxu1 %v3489_v62 }
0x1484   : > { %v2603_v53 = vpop.xlane.xlu0 %2602 }
0x1485   : > { %v2604_v54 = vmul.f32 0.0078125, %v2603_v53 }
0x1487   : > { %v2605_v55 = vsub.f32 %v2597_v50, %v2604_v54 }
0x1489   : > { %v2606_v56 = vmul.f32 %v2605_v55, %v2605_v55 }
0x148b   : > { %2607 = vadd.xlane.f32.xlu0 %v2606_v56 }
0x1518   : > { %v2608_v63 = vpop.xlane.xlu0 %2607 }
0x1519   : > { %v2609_v0 = vmul.f32 0.0078125, %v2608_v63 }
0x151b   : > { %v2610_v1 = vadd.f32 1e-12, %v2609_v0 }
0x151d   : > { %3522 = vrsqrt.f32 %v2610_v1 }
0x1527   : > { %v3523_v2 = vpop.eup %3522 }
0x1528   : > { %v2612_v5 = vmul.f32 %v3523_v2, %v2605_v55 }
0x152a   : > { %v2619_v7 = vmul.f32 %v3009_v4, %v2612_v5 }
0x152c   : > { %v2626_v39 = vadd.f32 %v3010_v6, %v2619_v7 }
0x152e   : > { %v2627_v9 = vpack.c.bf16 %v2626_v39, %v2626_v39 }
0x1530   : > { %3272 = vmatmul.mubr.bf16.vlgmr.msra.gmra.mrb[40].mxu1 %v2627_v9 }
0x1603   : > { %v2733_v10 = vpop.f32.mrb[40].mxu1 }
0x1604   : > { %v2734_v11 = vadd.f32 %v3011_v3, %v2733_v10  ;;  %v3273_v25 = vpop.f32.mrb[41].mxu1 }
0x1605   : > { %v2736_v12 = vpop.f32.mrb[42].mxu1 }
0x1606   : > { %2739 = vst [vmem:[%s587_s15] sm:$0xff] %v2734_v11  ;;  %v3274_v13 = vpop.f32.mrb[43].mxu1 }
0x1607 PF: > { %s4232_s24 = sld [smem:[#allocation9_spill]] }
0x160d   : > { %s29_s24 = sadd.s32 1, %s4232_s24  }
0x160e   : > { %p26_p5 = scmp.ge.s32.totalorder %s29_s24, 4  }
0x1610   :  { %28 = sbr.rel (!%p26_p5) target bundleno = 8 (0x8), region = 143 }
0x1617   :  { %2759 = vsyncpa [#allocation3], 1 }
0x1618   :  { %2761 = vsyncpa [#allocation3 + $0x1], 1 }
0x1619   :  { %2762 = vsyncpa [#allocation5], 1 }

</bundles_post_ra>
